<compile_context>
chip_gen: v7x
topology: tpu7x:2x2x1
jax: 0.10.0
libtpu: 0.0.40
codegen_flags: <defaults>
</compile_context>

<pallas_src>
import math
import numpy as np

import jax
import jax.numpy as jnp
from jax.experimental import pallas as pl
from jax.experimental.pallas import tpu as pltpu

# ----------------------------- configuration ---------------------------------
B_SIZE = 2            # batch
C_IMG = 3             # image channels
IMG = 16              # image height/width
PATCH = 8             # patch size
NUM_PATCHES = (IMG // PATCH) ** 2          # 4
PATCH_DIM = C_IMG * PATCH * PATCH          # 192
D_VIT = 24            # ViT hidden
VIT_HEADS = 2
VIT_HD = D_VIT // VIT_HEADS                # 12
VIT_MLP = 48
H_LLM = 32            # LLM hidden
LLM_HEADS = 2
LLM_HD = H_LLM // LLM_HEADS                # 16
LLM_MLP = 64
VOCAB = 128
T_TEXT = 8            # text tokens
L_IMG = 2 * NUM_PATCHES                    # 8 image tokens (A patches + B patches)
L_TOTAL = L_IMG + T_TEXT                   # combined sequence length = 16

# rows of the packed f32 aux buffer ([AUX_ROWS, 128])
ROW_VIT_PB, ROW_VIT_LN1W, ROW_VIT_LN1B, ROW_VIT_BQKV = 0, 1, 2, 3
ROW_VIT_BO, ROW_VIT_LN2W, ROW_VIT_LN2B, ROW_VIT_B1, ROW_VIT_B2 = 4, 5, 6, 7, 8
ROW_ALIGN_B, ROW_LLM_LN1, ROW_LLM_BQKV, ROW_LLM_LN2, ROW_LLM_LNF = 9, 10, 11, 12, 13
N_CONST_ROWS = 16
R_POS = N_CONST_ROWS                       # 16 : pos-embed rows (2*B*P, D_VIT)
R_ROPE = R_POS + 2 * B_SIZE * NUM_PATCHES  # 32 : cos|sin rows   (B*L, 2*H_LLM)
AUX_ROWS = R_ROPE + B_SIZE * L_TOTAL       # 64

# ----------------------------- in-kernel helpers ------------------------------


def _mxu(a, w):
    """bf16 MXU matmul with f32 accumulation (w is already bf16)."""
    return jnp.dot(a.astype(jnp.bfloat16), w, preferred_element_type=jnp.float32)


def _layernorm(x, w, b, eps=1e-5):
    mu = jnp.mean(x, axis=-1, keepdims=True)
    xc = x - mu
    var = jnp.mean(xc * xc, axis=-1, keepdims=True)
    return xc * jax.lax.rsqrt(var + eps) * w + b


def _rmsnorm(x, w, eps=1e-6):
    var = jnp.mean(x * x, axis=-1, keepdims=True)
    return x * jax.lax.rsqrt(var + eps) * w


def _softmax_lastdim(s):
    s = s - jnp.max(s, axis=-1, keepdims=True)
    p = jnp.exp(s)
    return p * pl.reciprocal(jnp.sum(p, axis=-1, keepdims=True), approx=True)


# ----------------------------- fully fused kernel -----------------------------


def _mm_kernel(patches_ref, ids_ref, mask_ref,
               vit_pw_ref, vit_wqkv_ref, vit_wo_ref, vit_w1_ref, vit_w2_ref,
               align_w_ref, embed_ref,
               llm_wqkv_ref, llm_wo_ref, llm_wgu_ref, llm_wd_ref, lmh_ref,
               rope_p_ref, aux_ref,
               o_ref, xf_ref):
    B, L, H = B_SIZE, L_TOTAL, H_LLM
    M = 2 * B_SIZE * NUM_PATCHES           # 16 patch rows, ordered (batch, image, patch)

    def crow(r, n):                          # one packed constant row, static slice
        return aux_ref[r:r + 1, :n]

    # ===================== ViT encoder (both images x both batches) ==========
    x = _mxu(patches_ref[...], vit_pw_ref[...]) + crow(ROW_VIT_PB, D_VIT)
    x = x + aux_ref[R_POS:R_POS + M, :D_VIT]                      # pos-embed (pre-tiled)

    # --- pre-LN self-attention (attention within each (batch, image) group) ---
    h = _layernorm(x, crow(ROW_VIT_LN1W, D_VIT), crow(ROW_VIT_LN1B, D_VIT))
    qkv = _mxu(h, vit_wqkv_ref[...]) + crow(ROW_VIT_BQKV, 3 * D_VIT)      # [M, 3*D_VIT]
    NG = 2 * B_SIZE                                                # attention groups
    q = qkv[:, :D_VIT].astype(jnp.bfloat16).reshape(NG, NUM_PATCHES, D_VIT)
    k = qkv[:, D_VIT:2 * D_VIT].astype(jnp.bfloat16).reshape(NG, NUM_PATCHES, D_VIT)
    v = qkv[:, 2 * D_VIT:].astype(jnp.bfloat16).reshape(NG, NUM_PATCHES, D_VIT)
    scale = 1.0 / math.sqrt(VIT_HD)
    heads = []
    for hh in range(VIT_HEADS):
        sl = slice(hh * VIT_HD, (hh + 1) * VIT_HD)
        s = jnp.einsum('bqd,bkd->bqk', q[..., sl], k[..., sl],
                       preferred_element_type=jnp.float32) * scale
        p = _softmax_lastdim(s)
        heads.append(jnp.einsum('bqk,bkd->bqd', p.astype(jnp.bfloat16), v[..., sl],
                                preferred_element_type=jnp.float32))
    attn = jnp.concatenate(heads, axis=-1).reshape(M, D_VIT)
    x = x + _mxu(attn, vit_wo_ref[...]) + crow(ROW_VIT_BO, D_VIT)

    # --- MLP block ---
    h = _layernorm(x, crow(ROW_VIT_LN2W, D_VIT), crow(ROW_VIT_LN2B, D_VIT))
    # TODO(synk): PyTorch nn.GELU defaults to exact erf; tanh approximation used here.
    h = jax.nn.gelu(_mxu(h, vit_w1_ref[...]) + crow(ROW_VIT_B1, VIT_MLP))
    x = x + _mxu(h, vit_w2_ref[...]) + crow(ROW_VIT_B2, D_VIT)

    # --- aligner (Linear D_VIT -> H_LLM); features stay resident in VMEM ---
    img_feat = _mxu(x, align_w_ref[...]) + crow(ROW_ALIGN_B, H)    # [M, H]

    # ===================== token embedding (one-hot on MXU) ===================
    ids = ids_ref[...]                                             # [B*T, 1] int32
    iota = jax.lax.broadcasted_iota(jnp.int32, (B * T_TEXT, VOCAB), 1)
    onehot = jnp.where(iota == ids, 1.0, 0.0)
    tok = _mxu(onehot, embed_ref[...])                             # [B*T, H]

    # ===================== sequence concat into VMEM scratch ==================
    # rows for batch b: [image-A patches(4), image-B patches(4), text tokens(8)]
    for b in range(B):
        xf_ref[b * L:b * L + L_IMG, :] = img_feat[b * L_IMG:(b + 1) * L_IMG, :]
        xf_ref[b * L + L_IMG:(b + 1) * L, :] = tok[b * T_TEXT:(b + 1) * T_TEXT, :]
    xf = xf_ref[...]                                               # [B*L, H]

    # ===================== additive attention bias (causal + key padding) =====
    row = jax.lax.broadcasted_iota(jnp.int32, (L, L), 0)
    col = jax.lax.broadcasted_iota(jnp.int32, (L, L), 1)
    causal = (col <= row).astype(jnp.float32)                      # [L, L]
    maskf = (mask_ref[...] > 0).astype(jnp.float32)                # [B, L]
    keep = causal[None, :, :] * maskf[:, None, :]                  # [B, L, L]
    bias = (keep - 1.0) * 1e9                                      # 0 keep, -1e9 drop

    # ===================== decoder layer: RMSNorm + QKV + RoPE + attention ====
    h = _rmsnorm(xf, crow(ROW_LLM_LN1, H))
    qkv = _mxu(h, llm_wqkv_ref[...]) + crow(ROW_LLM_BQKV, 3 * H)   # [B*L, 3H] f32
    q, k, v = qkv[:, :H], qkv[:, H:2 * H], qkv[:, 2 * H:]
    cos = aux_ref[R_ROPE:R_ROPE + B * L, :H]
    sin = aux_ref[R_ROPE:R_ROPE + B * L, H:2 * H]
    # rotate-half via static +/-1 permutation matrix on the (idle) MXU
    q = q * cos + _mxu(q, rope_p_ref[...]) * sin
    k = k * cos + _mxu(k, rope_p_ref[...]) * sin
    qb = q.astype(jnp.bfloat16).reshape(B, L, H)
    kb = k.astype(jnp.bfloat16).reshape(B, L, H)
    vb = v.astype(jnp.bfloat16).reshape(B, L, H)
    scale = 1.0 / math.sqrt(LLM_HD)
    heads = []
    for hh in range(LLM_HEADS):
        sl = slice(hh * LLM_HD, (hh + 1) * LLM_HD)
        s = jnp.einsum('bqd,bkd->bqk', qb[..., sl], kb[..., sl],
                       preferred_element_type=jnp.float32) * scale + bias
        pz = _softmax_lastdim(s)
        heads.append(jnp.einsum('bqk,bkd->bqd', pz.astype(jnp.bfloat16), vb[..., sl],
                                preferred_element_type=jnp.float32))
    attn = jnp.concatenate(heads, axis=-1).reshape(B * L, H)
    xf = xf + _mxu(attn, llm_wo_ref[...])

    # ===================== SwiGLU MLP (fused gate/up, lane-dense 128 cols) ====
    h = _rmsnorm(xf, crow(ROW_LLM_LN2, H))
    gu = _mxu(h, llm_wgu_ref[...])                                 # [B*L, 2*LLM_MLP]
    gate = jax.nn.silu(gu[:, :LLM_MLP])
    up = gu[:, LLM_MLP:]
    xf = xf + _mxu(gate * up, llm_wd_ref[...])

    # ===================== final norm + lm head (lane-dense [B*L, 128]) =======
    h = _rmsnorm(xf, crow(ROW_LLM_LNF, H))
    o_ref[...] = _mxu(h, lmh_ref[...]).astype(o_ref.dtype)


# ----------------------------- one-time parameter prep ------------------------


def prepare_params(p):
    """Hoisted out of the jitted forward: bf16 casts, fused weight concats, RoPE
    tables, pos-embed tiling, rotate-half permutation, packed bias/norm buffer."""
    bf = lambda w: jnp.asarray(w, jnp.bfloat16)

    def row(vec):
        vec = np.asarray(vec, np.float32).reshape(-1)
        out = np.zeros((1, 128), np.float32)
        out[0, :vec.shape[0]] = vec
        return out

    const_rows = np.concatenate([
        row(p["vit_patch_b"]), row(p["vit_ln1_w"]), row(p["vit_ln1_b"]),
        row(np.concatenate([np.asarray(p["vit_bq"]), np.asarray(p["vit_bk"]),
                            np.asarray(p["vit_bv"])])),
        row(p["vit_bo"]), row(p["vit_ln2_w"]), row(p["vit_ln2_b"]),
        row(p["vit_mlp_b1"]), row(p["vit_mlp_b2"]), row(p["align_b"]),
        row(p["llm_ln1_w"]),
        row(np.concatenate([np.asarray(p["llm_bq"]), np.asarray(p["llm_bk"]),
                            np.asarray(p["llm_bv"])])),
        row(p["llm_ln2_w"]), row(p["llm_lnf_w"]),
        np.zeros((N_CONST_ROWS - 14, 128), np.float32),
    ], axis=0)                                                     # [16, 128]

    # pos-embed tiled to the (batch, image, patch) row order of the fused ViT slab
    pos = np.tile(np.asarray(p["vit_pos"], np.float32), (2 * B_SIZE, 1))   # [16, D_VIT]
    pos_rows = np.zeros((2 * B_SIZE * NUM_PATCHES, 128), np.float32)
    pos_rows[:, :D_VIT] = pos

    # RoPE cos/sin tables, per-head layout, tiled to [B*L, H] and packed [cos|sin]
    half = LLM_HD // 2
    t = np.arange(L_TOTAL, dtype=np.float32)
    inv_freq = 1.0 / (10000.0 ** (np.arange(half, dtype=np.float32) / half))
    ang = t[:, None] * inv_freq[None, :]                           # [L, half]
    cos = np.tile(np.concatenate([np.cos(ang), np.cos(ang)], -1), (B_SIZE, LLM_HEADS))
    sin = np.tile(np.concatenate([np.sin(ang), np.sin(ang)], -1), (B_SIZE, LLM_HEADS))
    rope_rows = np.zeros((B_SIZE * L_TOTAL, 128), np.float32)
    rope_rows[:, :H_LLM] = cos
    rope_rows[:, H_LLM:2 * H_LLM] = sin

    aux = jnp.asarray(np.concatenate([const_rows, pos_rows, rope_rows], axis=0))

    # rotate-half as a signed permutation matrix (applied on the MXU in-kernel)
    P = np.zeros((H_LLM, H_LLM), np.float32)
    for h in range(LLM_HEADS):
        lo = h * LLM_HD
        for j in range(half):
            P[lo + half + j, lo + j] = -1.0     # rot[:, lo+j]      = -x[:, lo+half+j]
            P[lo + j, lo + half + j] = 1.0      # rot[:, lo+half+j] =  x[:, lo+j]

    return dict(
        vit_pw=bf(p["vit_patch_w"]),
        vit_wqkv=bf(jnp.concatenate([p["vit_wq"], p["vit_wk"], p["vit_wv"]], axis=1)),
        vit_wo=bf(p["vit_wo"]),
        vit_w1=bf(p["vit_mlp_w1"]),
        vit_w2=bf(p["vit_mlp_w2"]),
        align_w=bf(p["align_w"]),
        llm_embed=bf(p["llm_embed"]),
        llm_wqkv=bf(jnp.concatenate([p["llm_wq"], p["llm_wk"], p["llm_wv"]], axis=1)),
        llm_wo=bf(p["llm_wo"]),
        llm_wgu=bf(jnp.concatenate([p["llm_wg"], p["llm_wu"]], axis=1)),
        llm_wd=bf(p["llm_wd"]),
        llm_lmh=bf(p["llm_lm_head"]),
        rope_p=jnp.asarray(P, jnp.bfloat16),
        aux=aux,
    )


# ----------------------------- parameters ------------------------------------


def init_params(key):
    def nrm(k, shape, scale=0.02):
        return scale * jax.random.normal(k, shape, jnp.float32)

    keys = iter(jax.random.split(key, 48))
    p = {}
    # --- ViT image encoder ---
    p["vit_patch_w"] = nrm(next(keys), (PATCH_DIM, D_VIT))
    p["vit_patch_b"] = jnp.zeros((D_VIT,), jnp.float32)
    p["vit_pos"] = nrm(next(keys), (NUM_PATCHES, D_VIT))
    p["vit_ln1_w"] = jnp.ones((D_VIT,), jnp.float32)
    p["vit_ln1_b"] = jnp.zeros((D_VIT,), jnp.float32)
    for name in ("q", "k", "v", "o"):
        p[f"vit_w{name}"] = nrm(next(keys), (D_VIT, D_VIT))
        p[f"vit_b{name}"] = jnp.zeros((D_VIT,), jnp.float32)
    p["vit_ln2_w"] = jnp.ones((D_VIT,), jnp.float32)
    p["vit_ln2_b"] = jnp.zeros((D_VIT,), jnp.float32)
    p["vit_mlp_w1"] = nrm(next(keys), (D_VIT, VIT_MLP))
    p["vit_mlp_b1"] = jnp.zeros((VIT_MLP,), jnp.float32)
    p["vit_mlp_w2"] = nrm(next(keys), (VIT_MLP, D_VIT))
    p["vit_mlp_b2"] = jnp.zeros((D_VIT,), jnp.float32)
    # --- aligner (Linear D_VIT -> H_LLM) ---
    p["align_w"] = nrm(next(keys), (D_VIT, H_LLM))
    p["align_b"] = jnp.zeros((H_LLM,), jnp.float32)
    # --- Qwen2-style LLM (1 decoder layer) ---
    p["llm_embed"] = nrm(next(keys), (VOCAB, H_LLM))
    p["llm_ln1_w"] = jnp.ones((H_LLM,), jnp.float32)
    for name in ("q", "k", "v"):
        p[f"llm_w{name}"] = nrm(next(keys), (H_LLM, H_LLM))
        p[f"llm_b{name}"] = jnp.zeros((H_LLM,), jnp.float32)
    p["llm_wo"] = nrm(next(keys), (H_LLM, H_LLM))
    p["llm_ln2_w"] = jnp.ones((H_LLM,), jnp.float32)
    p["llm_wg"] = nrm(next(keys), (H_LLM, LLM_MLP))
    p["llm_wu"] = nrm(next(keys), (H_LLM, LLM_MLP))
    p["llm_wd"] = nrm(next(keys), (LLM_MLP, H_LLM))
    p["llm_lnf_w"] = jnp.ones((H_LLM,), jnp.float32)
    p["llm_lm_head"] = nrm(next(keys), (H_LLM, VOCAB))
    return p


# ----------------------------- forward ----------------------------------------


def extract_patches(image):
    """NCHW image -> [B, NUM_PATCHES, C*PATCH*PATCH] (== Conv2d stride=kernel=PATCH)."""
    B = image.shape[0]
    x = image.reshape(B, C_IMG, IMG // PATCH, PATCH, IMG // PATCH, PATCH)
    x = x.transpose(0, 2, 4, 1, 3, 5).reshape(B, NUM_PATCHES, PATCH_DIM)
    return x


def multimodal_forward(prep, input_ids, attention_mask, image_A, image_B):
    # device placement (.to(device_0/1)) from the PyTorch module is a no-op on one TPU.
    # TODO(synk): the PyTorch forward print()s features_A/B for debugging; omitted here.
    B = input_ids.shape[0]
    # Stack patch rows as (batch, image, patch) so that, after the in-kernel aligner,
    # rows b*8 .. b*8+7 are exactly cat([aligned_A[b], aligned_B[b]], dim=1).
    pA = extract_patches(image_A)
    pB = extract_patches(image_B)
    patches = jnp.stack([pA, pB], axis=1).reshape(2 * B * NUM_PATCHES, PATCH_DIM)
    ids = input_ids.reshape(B * T_TEXT, 1).astype(jnp.int32)
    mask = attention_mask.astype(jnp.int32)                        # [B, L_TOTAL]

    logits = pl.pallas_call(
        _mm_kernel,
        out_shape=jax.ShapeDtypeStruct((B * L_TOTAL, VOCAB), jnp.float32),
        scratch_shapes=[pltpu.VMEM((B * L_TOTAL, H_LLM), jnp.float32)],
    )(patches, ids, mask,
      prep["vit_pw"], prep["vit_wqkv"], prep["vit_wo"], prep["vit_w1"], prep["vit_w2"],
      prep["align_w"], prep["llm_embed"],
      prep["llm_wqkv"], prep["llm_wo"], prep["llm_wgu"], prep["llm_wd"], prep["llm_lmh"],
      prep["rope_p"], prep["aux"])
    return logits.reshape(B, L_TOTAL, VOCAB)


# ----------------------------- main -------------------------------------------

if __name__ == "__main__":
    key = jax.random.PRNGKey(0)
    pkey, k_imgA, k_imgB, k_ids = jax.random.split(key, 4)
    params = init_params(pkey)
    prep = prepare_params(params)          # one-time prep, outside the jitted forward

    image_A = jax.random.normal(k_imgA, (B_SIZE, C_IMG, IMG, IMG), jnp.float32)
    image_B = jax.random.normal(k_imgB, (B_SIZE, C_IMG, IMG, IMG), jnp.float32)
    input_ids = jax.random.randint(k_ids, (B_SIZE, T_TEXT), 0, VOCAB)
    attention_mask = jnp.ones((B_SIZE, L_TOTAL), jnp.int32)
    attention_mask = attention_mask.at[1, -2:].set(0)   # exercise key-padding masking

    fwd = jax.jit(multimodal_forward)
    logits = fwd(prep, input_ids, attention_mask, image_A, image_B)
    jax.block_until_ready(logits)
    assert logits.shape == (B_SIZE, L_TOTAL, VOCAB)
    assert bool(jnp.all(jnp.isfinite(logits)))
    print("KERNEL_OK")
</pallas_src>

<mosaic_0001>
module attributes {stable_mosaic.version = 11 : i64} {
  func.func @_mm_kernel(%arg0: memref<16x192xf32, #tpu.memory_space<vmem>>, %arg1: memref<16x1xi32, #tpu.memory_space<vmem>>, %arg2: memref<2x16xi32, #tpu.memory_space<vmem>>, %arg3: memref<192x24xbf16, #tpu.memory_space<vmem>>, %arg4: memref<24x72xbf16, #tpu.memory_space<vmem>>, %arg5: memref<24x24xbf16, #tpu.memory_space<vmem>>, %arg6: memref<24x48xbf16, #tpu.memory_space<vmem>>, %arg7: memref<48x24xbf16, #tpu.memory_space<vmem>>, %arg8: memref<24x32xbf16, #tpu.memory_space<vmem>>, %arg9: memref<128x32xbf16, #tpu.memory_space<vmem>>, %arg10: memref<32x96xbf16, #tpu.memory_space<vmem>>, %arg11: memref<32x32xbf16, #tpu.memory_space<vmem>>, %arg12: memref<32x128xbf16, #tpu.memory_space<vmem>>, %arg13: memref<64x32xbf16, #tpu.memory_space<vmem>>, %arg14: memref<32x128xbf16, #tpu.memory_space<vmem>>, %arg15: memref<32x32xbf16, #tpu.memory_space<vmem>>, %arg16: memref<64x128xf32, #tpu.memory_space<vmem>>, %arg17: memref<32x128xf32, #tpu.memory_space<vmem>>, %arg18: memref<32x32xf32, #tpu.memory_space<vmem>>) attributes {dimension_semantics = [], scalar_prefetch = 0 : i64, scratch_operands = 1 : i64, tpu.core_type = #tpu.core_type<tc>} {
    %c0 = arith.constant 0 : index
    %c0_0 = arith.constant 0 : index
    %0 = vector.load %arg0[%c0, %c0_0] : memref<16x192xf32, #tpu.memory_space<vmem>>, vector<16x192xf32>
    %c0_1 = arith.constant 0 : index
    %c0_2 = arith.constant 0 : index
    %1 = vector.load %arg3[%c0_1, %c0_2] : memref<192x24xbf16, #tpu.memory_space<vmem>>, vector<192x24xbf16>
    %2 = arith.truncf %0 : vector<16x192xf32> to vector<16x192xbf16>
    %cst = arith.constant dense<0.000000e+00> : vector<16x24xf32>
    %3 = tpu.matmul %2, %1, %cst {dimension_numbers = #tpu.dot_dimension_numbers<[1], [0], [0], [1], [0, 0, 1, 1], [], []>} : vector<16x192xbf16>, vector<192x24xbf16>, vector<16x24xf32> -> vector<16x24xf32>
    %c0_3 = arith.constant 0 : index
    %c0_4 = arith.constant 0 : index
    %4 = vector.load %arg16[%c0_3, %c0_4] : memref<64x128xf32, #tpu.memory_space<vmem>>, vector<1x24xf32>
    %5 = vector.broadcast %4 : vector<1x24xf32> to vector<16x24xf32>
    %6 = arith.addf %3, %5 : vector<16x24xf32>
    %c16 = arith.constant 16 : index
    %c0_5 = arith.constant 0 : index
    %7 = vector.load %arg16[%c16, %c0_5] : memref<64x128xf32, #tpu.memory_space<vmem>>, vector<16x24xf32>
    %8 = arith.addf %6, %7 : vector<16x24xf32>
    %c1 = arith.constant 1 : index
    %c0_6 = arith.constant 0 : index
    %9 = vector.load %arg16[%c1, %c0_6] : memref<64x128xf32, #tpu.memory_space<vmem>>, vector<1x24xf32>
    %c2 = arith.constant 2 : index
    %c0_7 = arith.constant 0 : index
    %10 = vector.load %arg16[%c2, %c0_7] : memref<64x128xf32, #tpu.memory_space<vmem>>, vector<1x24xf32>
    %cst_8 = arith.constant dense<0.000000e+00> : vector<16xf32>
    %11 = vector.multi_reduction <add>, %8, %cst_8 [1] : vector<16x24xf32> to vector<16xf32>
    %12 = vector.shape_cast %11 : vector<16xf32> to vector<16x1xf32>
    %cst_9 = arith.constant 2.400000e+01 : f32
    %13 = vector.broadcast %cst_9 : f32 to vector<16x1xf32>
    %14 = arith.divf %12, %13 : vector<16x1xf32>
    %15 = vector.broadcast %14 : vector<16x1xf32> to vector<16x24xf32>
    %16 = arith.subf %8, %15 : vector<16x24xf32>
    %17 = arith.mulf %16, %16 : vector<16x24xf32>
    %cst_10 = arith.constant dense<0.000000e+00> : vector<16xf32>
    %18 = vector.multi_reduction <add>, %17, %cst_10 [1] : vector<16x24xf32> to vector<16xf32>
    %19 = vector.shape_cast %18 : vector<16xf32> to vector<16x1xf32>
    %cst_11 = arith.constant 2.400000e+01 : f32
    %20 = vector.broadcast %cst_11 : f32 to vector<16x1xf32>
    %21 = arith.divf %19, %20 : vector<16x1xf32>
    %cst_12 = arith.constant 9.99999974E-6 : f32
    %22 = vector.broadcast %cst_12 : f32 to vector<16x1xf32>
    %23 = arith.addf %21, %22 : vector<16x1xf32>
    %24 = math.rsqrt %23 : vector<16x1xf32>
    %25 = vector.broadcast %24 : vector<16x1xf32> to vector<16x24xf32>
    %26 = arith.mulf %16, %25 : vector<16x24xf32>
    %27 = vector.broadcast %9 : vector<1x24xf32> to vector<16x24xf32>
    %28 = arith.mulf %26, %27 : vector<16x24xf32>
    %29 = vector.broadcast %10 : vector<1x24xf32> to vector<16x24xf32>
    %30 = arith.addf %28, %29 : vector<16x24xf32>
    %c0_13 = arith.constant 0 : index
    %c0_14 = arith.constant 0 : index
    %31 = vector.load %arg4[%c0_13, %c0_14] : memref<24x72xbf16, #tpu.memory_space<vmem>>, vector<24x72xbf16>
    %32 = arith.truncf %30 : vector<16x24xf32> to vector<16x24xbf16>
    %cst_15 = arith.constant dense<0.000000e+00> : vector<16x72xf32>
    %33 = tpu.matmul %32, %31, %cst_15 {dimension_numbers = #tpu.dot_dimension_numbers<[1], [0], [0], [1], [0, 0, 1, 1], [], []>} : vector<16x24xbf16>, vector<24x72xbf16>, vector<16x72xf32> -> vector<16x72xf32>
    %c3 = arith.constant 3 : index
    %c0_16 = arith.constant 0 : index
    %34 = vector.load %arg16[%c3, %c0_16] : memref<64x128xf32, #tpu.memory_space<vmem>>, vector<1x72xf32>
    %35 = vector.broadcast %34 : vector<1x72xf32> to vector<16x72xf32>
    %36 = arith.addf %33, %35 : vector<16x72xf32>
    %37 = vector.extract_strided_slice %36 {offsets = [0, 0], sizes = [16, 24], strides = [1, 1]} : vector<16x72xf32> to vector<16x24xf32>
    %38 = arith.truncf %37 : vector<16x24xf32> to vector<16x24xbf16>
    %39 = vector.shape_cast %38 : vector<16x24xbf16> to vector<4x4x24xbf16>
    %40 = vector.extract_strided_slice %36 {offsets = [0, 24], sizes = [16, 24], strides = [1, 1]} : vector<16x72xf32> to vector<16x24xf32>
    %41 = arith.truncf %40 : vector<16x24xf32> to vector<16x24xbf16>
    %42 = vector.shape_cast %41 : vector<16x24xbf16> to vector<4x4x24xbf16>
    %43 = vector.extract_strided_slice %36 {offsets = [0, 48], sizes = [16, 24], strides = [1, 1]} : vector<16x72xf32> to vector<16x24xf32>
    %44 = arith.truncf %43 : vector<16x24xf32> to vector<16x24xbf16>
    %45 = vector.shape_cast %44 : vector<16x24xbf16> to vector<4x4x24xbf16>
    %46 = vector.extract_strided_slice %39 {offsets = [0, 0, 0], sizes = [4, 4, 12], strides = [1, 1, 1]} : vector<4x4x24xbf16> to vector<4x4x12xbf16>
    %47 = vector.extract_strided_slice %42 {offsets = [0, 0, 0], sizes = [4, 4, 12], strides = [1, 1, 1]} : vector<4x4x24xbf16> to vector<4x4x12xbf16>
    "tpu.trace_start"() <{level = 10 : i32, message = "bqd,bkd->bqk"}> : () -> ()
    %cst_17 = arith.constant dense<0.000000e+00> : vector<4x4x4xf32>
    %48 = tpu.matmul %46, %47, %cst_17 {dimension_numbers = #tpu.dot_dimension_numbers<[2], [2], [1], [1], [0, 0, 0, 1, 1, 1], [0], [0]>} : vector<4x4x12xbf16>, vector<4x4x12xbf16>, vector<4x4x4xf32> -> vector<4x4x4xf32>
    "tpu.trace_stop"() : () -> ()
    %cst_18 = arith.constant 0.288675129 : f32
    %49 = vector.broadcast %cst_18 : f32 to vector<4x4x4xf32>
    %50 = arith.mulf %48, %49 : vector<4x4x4xf32>
    %cst_19 = arith.constant dense<0xFF800000> : vector<4x4xf32>
    %51 = vector.multi_reduction <maximumf>, %50, %cst_19 [2] : vector<4x4x4xf32> to vector<4x4xf32>
    %52 = vector.shape_cast %51 : vector<4x4xf32> to vector<4x4x1xf32>
    %53 = vector.broadcast %52 : vector<4x4x1xf32> to vector<4x4x4xf32>
    %54 = arith.subf %50, %53 : vector<4x4x4xf32>
    %55 = math.exp %54 : vector<4x4x4xf32>
    %cst_20 = arith.constant dense<0.000000e+00> : vector<4x4xf32>
    %56 = vector.multi_reduction <add>, %55, %cst_20 [2] : vector<4x4x4xf32> to vector<4x4xf32>
    %57 = vector.shape_cast %56 : vector<4x4xf32> to vector<4x4x1xf32>
    %58 = tpu.reciprocal %57 {approx = true} : vector<4x4x1xf32> -> vector<4x4x1xf32>
    %59 = vector.broadcast %58 : vector<4x4x1xf32> to vector<4x4x4xf32>
    %60 = arith.mulf %55, %59 : vector<4x4x4xf32>
    %61 = arith.truncf %60 : vector<4x4x4xf32> to vector<4x4x4xbf16>
    %62 = vector.extract_strided_slice %45 {offsets = [0, 0, 0], sizes = [4, 4, 12], strides = [1, 1, 1]} : vector<4x4x24xbf16> to vector<4x4x12xbf16>
    "tpu.trace_start"() <{level = 10 : i32, message = "bqk,bkd->bqd"}> : () -> ()
    %cst_21 = arith.constant dense<0.000000e+00> : vector<4x4x12xf32>
    %63 = tpu.matmul %61, %62, %cst_21 {dimension_numbers = #tpu.dot_dimension_numbers<[2], [1], [1], [2], [0, 0, 0, 1, 1, 2], [0], [0]>} : vector<4x4x4xbf16>, vector<4x4x12xbf16>, vector<4x4x12xf32> -> vector<4x4x12xf32>
    "tpu.trace_stop"() : () -> ()
    %64 = vector.extract_strided_slice %39 {offsets = [0, 0, 12], sizes = [4, 4, 12], strides = [1, 1, 1]} : vector<4x4x24xbf16> to vector<4x4x12xbf16>
    %65 = vector.extract_strided_slice %42 {offsets = [0, 0, 12], sizes = [4, 4, 12], strides = [1, 1, 1]} : vector<4x4x24xbf16> to vector<4x4x12xbf16>
    "tpu.trace_start"() <{level = 10 : i32, message = "bqd,bkd->bqk"}> : () -> ()
    %cst_22 = arith.constant dense<0.000000e+00> : vector<4x4x4xf32>
    %66 = tpu.matmul %64, %65, %cst_22 {dimension_numbers = #tpu.dot_dimension_numbers<[2], [2], [1], [1], [0, 0, 0, 1, 1, 1], [0], [0]>} : vector<4x4x12xbf16>, vector<4x4x12xbf16>, vector<4x4x4xf32> -> vector<4x4x4xf32>
    "tpu.trace_stop"() : () -> ()
    %cst_23 = arith.constant 0.288675129 : f32
    %67 = vector.broadcast %cst_23 : f32 to vector<4x4x4xf32>
    %68 = arith.mulf %66, %67 : vector<4x4x4xf32>
    %cst_24 = arith.constant dense<0xFF800000> : vector<4x4xf32>
    %69 = vector.multi_reduction <maximumf>, %68, %cst_24 [2] : vector<4x4x4xf32> to vector<4x4xf32>
    %70 = vector.shape_cast %69 : vector<4x4xf32> to vector<4x4x1xf32>
    %71 = vector.broadcast %70 : vector<4x4x1xf32> to vector<4x4x4xf32>
    %72 = arith.subf %68, %71 : vector<4x4x4xf32>
    %73 = math.exp %72 : vector<4x4x4xf32>
    %cst_25 = arith.constant dense<0.000000e+00> : vector<4x4xf32>
    %74 = vector.multi_reduction <add>, %73, %cst_25 [2] : vector<4x4x4xf32> to vector<4x4xf32>
    %75 = vector.shape_cast %74 : vector<4x4xf32> to vector<4x4x1xf32>
    %76 = tpu.reciprocal %75 {approx = true} : vector<4x4x1xf32> -> vector<4x4x1xf32>
    %77 = vector.broadcast %76 : vector<4x4x1xf32> to vector<4x4x4xf32>
    %78 = arith.mulf %73, %77 : vector<4x4x4xf32>
    %79 = arith.truncf %78 : vector<4x4x4xf32> to vector<4x4x4xbf16>
    %80 = vector.extract_strided_slice %45 {offsets = [0, 0, 12], sizes = [4, 4, 12], strides = [1, 1, 1]} : vector<4x4x24xbf16> to vector<4x4x12xbf16>
    "tpu.trace_start"() <{level = 10 : i32, message = "bqk,bkd->bqd"}> : () -> ()
    %cst_26 = arith.constant dense<0.000000e+00> : vector<4x4x12xf32>
    %81 = tpu.matmul %79, %80, %cst_26 {dimension_numbers = #tpu.dot_dimension_numbers<[2], [1], [1], [2], [0, 0, 0, 1, 1, 2], [0], [0]>} : vector<4x4x4xbf16>, vector<4x4x12xbf16>, vector<4x4x12xf32> -> vector<4x4x12xf32>
    "tpu.trace_stop"() : () -> ()
    %82 = tpu.concatenate %63, %81 in 2 : vector<4x4x12xf32>, vector<4x4x12xf32> -> vector<4x4x24xf32>
    %83 = vector.shape_cast %82 : vector<4x4x24xf32> to vector<16x24xf32>
    %c0_27 = arith.constant 0 : index
    %c0_28 = arith.constant 0 : index
    %84 = vector.load %arg5[%c0_27, %c0_28] : memref<24x24xbf16, #tpu.memory_space<vmem>>, vector<24x24xbf16>
    %85 = arith.truncf %83 : vector<16x24xf32> to vector<16x24xbf16>
    %cst_29 = arith.constant dense<0.000000e+00> : vector<16x24xf32>
    %86 = tpu.matmul %85, %84, %cst_29 {dimension_numbers = #tpu.dot_dimension_numbers<[1], [0], [0], [1], [0, 0, 1, 1], [], []>} : vector<16x24xbf16>, vector<24x24xbf16>, vector<16x24xf32> -> vector<16x24xf32>
    %87 = arith.addf %8, %86 : vector<16x24xf32>
    %c4 = arith.constant 4 : index
    %c0_30 = arith.constant 0 : index
    %88 = vector.load %arg16[%c4, %c0_30] : memref<64x128xf32, #tpu.memory_space<vmem>>, vector<1x24xf32>
    %89 = vector.broadcast %88 : vector<1x24xf32> to vector<16x24xf32>
    %90 = arith.addf %87, %89 : vector<16x24xf32>
    %c5 = arith.constant 5 : index
    %c0_31 = arith.constant 0 : index
    %91 = vector.load %arg16[%c5, %c0_31] : memref<64x128xf32, #tpu.memory_space<vmem>>, vector<1x24xf32>
    %c6 = arith.constant 6 : index
    %c0_32 = arith.constant 0 : index
    %92 = vector.load %arg16[%c6, %c0_32] : memref<64x128xf32, #tpu.memory_space<vmem>>, vector<1x24xf32>
    %cst_33 = arith.constant dense<0.000000e+00> : vector<16xf32>
    %93 = vector.multi_reduction <add>, %90, %cst_33 [1] : vector<16x24xf32> to vector<16xf32>
    %94 = vector.shape_cast %93 : vector<16xf32> to vector<16x1xf32>
    %cst_34 = arith.constant 2.400000e+01 : f32
    %95 = vector.broadcast %cst_34 : f32 to vector<16x1xf32>
    %96 = arith.divf %94, %95 : vector<16x1xf32>
    %97 = vector.broadcast %96 : vector<16x1xf32> to vector<16x24xf32>
    %98 = arith.subf %90, %97 : vector<16x24xf32>
    %99 = arith.mulf %98, %98 : vector<16x24xf32>
    %cst_35 = arith.constant dense<0.000000e+00> : vector<16xf32>
    %100 = vector.multi_reduction <add>, %99, %cst_35 [1] : vector<16x24xf32> to vector<16xf32>
    %101 = vector.shape_cast %100 : vector<16xf32> to vector<16x1xf32>
    %cst_36 = arith.constant 2.400000e+01 : f32
    %102 = vector.broadcast %cst_36 : f32 to vector<16x1xf32>
    %103 = arith.divf %101, %102 : vector<16x1xf32>
    %cst_37 = arith.constant 9.99999974E-6 : f32
    %104 = vector.broadcast %cst_37 : f32 to vector<16x1xf32>
    %105 = arith.addf %103, %104 : vector<16x1xf32>
    %106 = math.rsqrt %105 : vector<16x1xf32>
    %107 = vector.broadcast %106 : vector<16x1xf32> to vector<16x24xf32>
    %108 = arith.mulf %98, %107 : vector<16x24xf32>
    %109 = vector.broadcast %91 : vector<1x24xf32> to vector<16x24xf32>
    %110 = arith.mulf %108, %109 : vector<16x24xf32>
    %111 = vector.broadcast %92 : vector<1x24xf32> to vector<16x24xf32>
    %112 = arith.addf %110, %111 : vector<16x24xf32>
    %c0_38 = arith.constant 0 : index
    %c0_39 = arith.constant 0 : index
    %113 = vector.load %arg6[%c0_38, %c0_39] : memref<24x48xbf16, #tpu.memory_space<vmem>>, vector<24x48xbf16>
    %114 = arith.truncf %112 : vector<16x24xf32> to vector<16x24xbf16>
    %cst_40 = arith.constant dense<0.000000e+00> : vector<16x48xf32>
    %115 = tpu.matmul %114, %113, %cst_40 {dimension_numbers = #tpu.dot_dimension_numbers<[1], [0], [0], [1], [0, 0, 1, 1], [], []>} : vector<16x24xbf16>, vector<24x48xbf16>, vector<16x48xf32> -> vector<16x48xf32>
    %c7 = arith.constant 7 : index
    %c0_41 = arith.constant 0 : index
    %116 = vector.load %arg16[%c7, %c0_41] : memref<64x128xf32, #tpu.memory_space<vmem>>, vector<1x48xf32>
    %117 = vector.broadcast %116 : vector<1x48xf32> to vector<16x48xf32>
    %118 = arith.addf %115, %117 : vector<16x48xf32>
    %119 = arith.mulf %118, %118 : vector<16x48xf32>
    %120 = arith.mulf %118, %119 : vector<16x48xf32>
    %cst_42 = arith.constant 4.471500e-02 : f32
    %121 = vector.broadcast %cst_42 : f32 to vector<16x48xf32>
    %122 = arith.mulf %121, %120 : vector<16x48xf32>
    %123 = arith.addf %118, %122 : vector<16x48xf32>
    %cst_43 = arith.constant 0.797884583 : f32
    %124 = vector.broadcast %cst_43 : f32 to vector<16x48xf32>
    %125 = arith.mulf %124, %123 : vector<16x48xf32>
    %126 = math.tanh %125 : vector<16x48xf32>
    %cst_44 = arith.constant 1.000000e+00 : f32
    %127 = vector.broadcast %cst_44 : f32 to vector<16x48xf32>
    %128 = arith.addf %127, %126 : vector<16x48xf32>
    %cst_45 = arith.constant 5.000000e-01 : f32
    %129 = vector.broadcast %cst_45 : f32 to vector<16x48xf32>
    %130 = arith.mulf %129, %128 : vector<16x48xf32>
    %131 = arith.mulf %118, %130 : vector<16x48xf32>
    %c0_46 = arith.constant 0 : index
    %c0_47 = arith.constant 0 : index
    %132 = vector.load %arg7[%c0_46, %c0_47] : memref<48x24xbf16, #tpu.memory_space<vmem>>, vector<48x24xbf16>
    %133 = arith.truncf %131 : vector<16x48xf32> to vector<16x48xbf16>
    %cst_48 = arith.constant dense<0.000000e+00> : vector<16x24xf32>
    %134 = tpu.matmul %133, %132, %cst_48 {dimension_numbers = #tpu.dot_dimension_numbers<[1], [0], [0], [1], [0, 0, 1, 1], [], []>} : vector<16x48xbf16>, vector<48x24xbf16>, vector<16x24xf32> -> vector<16x24xf32>
    %135 = arith.addf %90, %134 : vector<16x24xf32>
    %c8 = arith.constant 8 : index
    %c0_49 = arith.constant 0 : index
    %136 = vector.load %arg16[%c8, %c0_49] : memref<64x128xf32, #tpu.memory_space<vmem>>, vector<1x24xf32>
    %137 = vector.broadcast %136 : vector<1x24xf32> to vector<16x24xf32>
    %138 = arith.addf %135, %137 : vector<16x24xf32>
    %c0_50 = arith.constant 0 : index
    %c0_51 = arith.constant 0 : index
    %139 = vector.load %arg8[%c0_50, %c0_51] : memref<24x32xbf16, #tpu.memory_space<vmem>>, vector<24x32xbf16>
    %140 = arith.truncf %138 : vector<16x24xf32> to vector<16x24xbf16>
    %cst_52 = arith.constant dense<0.000000e+00> : vector<16x32xf32>
    %141 = tpu.matmul %140, %139, %cst_52 {dimension_numbers = #tpu.dot_dimension_numbers<[1], [0], [0], [1], [0, 0, 1, 1], [], []>} : vector<16x24xbf16>, vector<24x32xbf16>, vector<16x32xf32> -> vector<16x32xf32>
    %c9 = arith.constant 9 : index
    %c0_53 = arith.constant 0 : index
    %142 = vector.load %arg16[%c9, %c0_53] : memref<64x128xf32, #tpu.memory_space<vmem>>, vector<1x32xf32>
    %143 = vector.broadcast %142 : vector<1x32xf32> to vector<16x32xf32>
    %144 = arith.addf %141, %143 : vector<16x32xf32>
    %c0_54 = arith.constant 0 : index
    %c0_55 = arith.constant 0 : index
    %145 = vector.load %arg1[%c0_54, %c0_55] : memref<16x1xi32, #tpu.memory_space<vmem>>, vector<16x1xi32>
    %146 = tpu.iota {dimensions = array<i32: 1>} : vector<16x128xi32>
    %147 = vector.broadcast %145 : vector<16x1xi32> to vector<16x128xi32>
    %148 = arith.cmpi eq, %146, %147 : vector<16x128xi32>
    %cst_56 = arith.constant 1.000000e+00 : f32
    %cst_57 = arith.constant 0.000000e+00 : f32
    %149 = vector.broadcast %cst_56 : f32 to vector<16x128xf32>
    %150 = vector.broadcast %cst_57 : f32 to vector<16x128xf32>
    %151 = arith.select %148, %149, %150 : vector<16x128xi1>, vector<16x128xf32>
    %c0_58 = arith.constant 0 : index
    %c0_59 = arith.constant 0 : index
    %152 = vector.load %arg9[%c0_58, %c0_59] : memref<128x32xbf16, #tpu.memory_space<vmem>>, vector<128x32xbf16>
    %153 = arith.truncf %151 : vector<16x128xf32> to vector<16x128xbf16>
    %cst_60 = arith.constant dense<0.000000e+00> : vector<16x32xf32>
    %154 = tpu.matmul %153, %152, %cst_60 {dimension_numbers = #tpu.dot_dimension_numbers<[1], [0], [0], [1], [0, 0, 1, 1], [], []>} : vector<16x128xbf16>, vector<128x32xbf16>, vector<16x32xf32> -> vector<16x32xf32>
    %155 = vector.extract_strided_slice %144 {offsets = [0, 0], sizes = [8, 32], strides = [1, 1]} : vector<16x32xf32> to vector<8x32xf32>
    %c0_61 = arith.constant 0 : index
    %c0_62 = arith.constant 0 : index
    %156 = vector.load %arg18[%c0_61, %c0_62] : memref<32x32xf32, #tpu.memory_space<vmem>>, vector<8x32xf32>
    tpu.vector_store %arg18[%c0_61, %c0_62], %155 {strides = array<i32>} : memref<32x32xf32, #tpu.memory_space<vmem>>, vector<8x32xf32>,
    %157 = vector.extract_strided_slice %154 {offsets = [0, 0], sizes = [8, 32], strides = [1, 1]} : vector<16x32xf32> to vector<8x32xf32>
    %c8_63 = arith.constant 8 : index
    %c0_64 = arith.constant 0 : index
    %158 = vector.load %arg18[%c8_63, %c0_64] : memref<32x32xf32, #tpu.memory_space<vmem>>, vector<8x32xf32>
    tpu.vector_store %arg18[%c8_63, %c0_64], %157 {strides = array<i32>} : memref<32x32xf32, #tpu.memory_space<vmem>>, vector<8x32xf32>,
    %159 = vector.extract_strided_slice %144 {offsets = [8, 0], sizes = [8, 32], strides = [1, 1]} : vector<16x32xf32> to vector<8x32xf32>
    %c16_65 = arith.constant 16 : index
    %c0_66 = arith.constant 0 : index
    %160 = vector.load %arg18[%c16_65, %c0_66] : memref<32x32xf32, #tpu.memory_space<vmem>>, vector<8x32xf32>
    tpu.vector_store %arg18[%c16_65, %c0_66], %159 {strides = array<i32>} : memref<32x32xf32, #tpu.memory_space<vmem>>, vector<8x32xf32>,
    %161 = vector.extract_strided_slice %154 {offsets = [8, 0], sizes = [8, 32], strides = [1, 1]} : vector<16x32xf32> to vector<8x32xf32>
    %c24 = arith.constant 24 : index
    %c0_67 = arith.constant 0 : index
    %162 = vector.load %arg18[%c24, %c0_67] : memref<32x32xf32, #tpu.memory_space<vmem>>, vector<8x32xf32>
    tpu.vector_store %arg18[%c24, %c0_67], %161 {strides = array<i32>} : memref<32x32xf32, #tpu.memory_space<vmem>>, vector<8x32xf32>,
    %c0_68 = arith.constant 0 : index
    %c0_69 = arith.constant 0 : index
    %163 = vector.load %arg18[%c0_68, %c0_69] : memref<32x32xf32, #tpu.memory_space<vmem>>, vector<32x32xf32>
    %164 = tpu.iota {dimensions = array<i32: 0>} : vector<16x16xi32>
    %165 = tpu.iota {dimensions = array<i32: 1>} : vector<16x16xi32>
    %166 = arith.cmpi sle, %165, %164 : vector<16x16xi32>
    %167 = arith.extui %166 : vector<16x16xi1> to vector<16x16xi32>
    %168 = arith.sitofp %167 : vector<16x16xi32> to vector<16x16xf32>
    %c0_70 = arith.constant 0 : index
    %c0_71 = arith.constant 0 : index
    %169 = vector.load %arg2[%c0_70, %c0_71] : memref<2x16xi32, #tpu.memory_space<vmem>>, vector<2x16xi32>
    %c0_i32 = arith.constant 0 : i32
    %170 = vector.broadcast %c0_i32 : i32 to vector<2x16xi32>
    %171 = arith.cmpi sgt, %169, %170 : vector<2x16xi32>
    %172 = arith.extui %171 : vector<2x16xi1> to vector<2x16xi32>
    %173 = arith.sitofp %172 : vector<2x16xi32> to vector<2x16xf32>
    %174 = vector.shape_cast %168 : vector<16x16xf32> to vector<1x16x16xf32>
    %175 = vector.shape_cast %173 : vector<2x16xf32> to vector<2x1x16xf32>
    %176 = vector.broadcast %174 : vector<1x16x16xf32> to vector<2x16x16xf32>
    %177 = vector.broadcast %175 : vector<2x1x16xf32> to vector<2x16x16xf32>
    %178 = arith.mulf %176, %177 : vector<2x16x16xf32>
    %cst_72 = arith.constant 1.000000e+00 : f32
    %179 = vector.broadcast %cst_72 : f32 to vector<2x16x16xf32>
    %180 = arith.subf %178, %179 : vector<2x16x16xf32>
    %cst_73 = arith.constant 1.000000e+09 : f32
    %181 = vector.broadcast %cst_73 : f32 to vector<2x16x16xf32>
    %182 = arith.mulf %180, %181 : vector<2x16x16xf32>
    %c10 = arith.constant 10 : index
    %c0_74 = arith.constant 0 : index
    %183 = vector.load %arg16[%c10, %c0_74] : memref<64x128xf32, #tpu.memory_space<vmem>>, vector<1x32xf32>
    %184 = arith.mulf %163, %163 : vector<32x32xf32>
    %cst_75 = arith.constant dense<0.000000e+00> : vector<32xf32>
    %185 = vector.multi_reduction <add>, %184, %cst_75 [1] : vector<32x32xf32> to vector<32xf32>
    %186 = vector.shape_cast %185 : vector<32xf32> to vector<32x1xf32>
    %cst_76 = arith.constant 3.200000e+01 : f32
    %187 = vector.broadcast %cst_76 : f32 to vector<32x1xf32>
    %188 = arith.divf %186, %187 : vector<32x1xf32>
    %cst_77 = arith.constant 9.99999997E-7 : f32
    %189 = vector.broadcast %cst_77 : f32 to vector<32x1xf32>
    %190 = arith.addf %188, %189 : vector<32x1xf32>
    %191 = math.rsqrt %190 : vector<32x1xf32>
    %192 = vector.broadcast %191 : vector<32x1xf32> to vector<32x32xf32>
    %193 = arith.mulf %163, %192 : vector<32x32xf32>
    %194 = vector.broadcast %183 : vector<1x32xf32> to vector<32x32xf32>
    %195 = arith.mulf %193, %194 : vector<32x32xf32>
    %c0_78 = arith.constant 0 : index
    %c0_79 = arith.constant 0 : index
    %196 = vector.load %arg10[%c0_78, %c0_79] : memref<32x96xbf16, #tpu.memory_space<vmem>>, vector<32x96xbf16>
    %197 = arith.truncf %195 : vector<32x32xf32> to vector<32x32xbf16>
    %cst_80 = arith.constant dense<0.000000e+00> : vector<32x96xf32>
    %198 = tpu.matmul %197, %196, %cst_80 {dimension_numbers = #tpu.dot_dimension_numbers<[1], [0], [0], [1], [0, 0, 1, 1], [], []>} : vector<32x32xbf16>, vector<32x96xbf16>, vector<32x96xf32> -> vector<32x96xf32>
    %c11 = arith.constant 11 : index
    %c0_81 = arith.constant 0 : index
    %199 = vector.load %arg16[%c11, %c0_81] : memref<64x128xf32, #tpu.memory_space<vmem>>, vector<1x96xf32>
    %200 = vector.broadcast %199 : vector<1x96xf32> to vector<32x96xf32>
    %201 = arith.addf %198, %200 : vector<32x96xf32>
    %202 = vector.extract_strided_slice %201 {offsets = [0, 0], sizes = [32, 32], strides = [1, 1]} : vector<32x96xf32> to vector<32x32xf32>
    %203 = vector.extract_strided_slice %201 {offsets = [0, 32], sizes = [32, 32], strides = [1, 1]} : vector<32x96xf32> to vector<32x32xf32>
    %204 = vector.extract_strided_slice %201 {offsets = [0, 64], sizes = [32, 32], strides = [1, 1]} : vector<32x96xf32> to vector<32x32xf32>
    %c32 = arith.constant 32 : index
    %c0_82 = arith.constant 0 : index
    %205 = vector.load %arg16[%c32, %c0_82] : memref<64x128xf32, #tpu.memory_space<vmem>>, vector<32x32xf32>
    %c32_83 = arith.constant 32 : index
    %c32_84 = arith.constant 32 : index
    %206 = vector.load %arg16[%c32_83, %c32_84] : memref<64x128xf32, #tpu.memory_space<vmem>>, vector<32x32xf32>
    %207 = arith.mulf %202, %205 : vector<32x32xf32>
    %c0_85 = arith.constant 0 : index
    %c0_86 = arith.constant 0 : index
    %208 = vector.load %arg15[%c0_85, %c0_86] : memref<32x32xbf16, #tpu.memory_space<vmem>>, vector<32x32xbf16>
    %209 = arith.truncf %202 : vector<32x32xf32> to vector<32x32xbf16>
    %cst_87 = arith.constant dense<0.000000e+00> : vector<32x32xf32>
    %210 = tpu.matmul %209, %208, %cst_87 {dimension_numbers = #tpu.dot_dimension_numbers<[1], [0], [0], [1], [0, 0, 1, 1], [], []>} : vector<32x32xbf16>, vector<32x32xbf16>, vector<32x32xf32> -> vector<32x32xf32>
    %211 = arith.mulf %210, %206 : vector<32x32xf32>
    %212 = arith.addf %207, %211 : vector<32x32xf32>
    %213 = arith.mulf %203, %205 : vector<32x32xf32>
    %c0_88 = arith.constant 0 : index
    %c0_89 = arith.constant 0 : index
    %214 = vector.load %arg15[%c0_88, %c0_89] : memref<32x32xbf16, #tpu.memory_space<vmem>>, vector<32x32xbf16>
    %215 = arith.truncf %203 : vector<32x32xf32> to vector<32x32xbf16>
    %cst_90 = arith.constant dense<0.000000e+00> : vector<32x32xf32>
    %216 = tpu.matmul %215, %214, %cst_90 {dimension_numbers = #tpu.dot_dimension_numbers<[1], [0], [0], [1], [0, 0, 1, 1], [], []>} : vector<32x32xbf16>, vector<32x32xbf16>, vector<32x32xf32> -> vector<32x32xf32>
    %217 = arith.mulf %216, %206 : vector<32x32xf32>
    %218 = arith.addf %213, %217 : vector<32x32xf32>
    %219 = arith.truncf %212 : vector<32x32xf32> to vector<32x32xbf16>
    %220 = vector.shape_cast %219 : vector<32x32xbf16> to vector<2x16x32xbf16>
    %221 = arith.truncf %218 : vector<32x32xf32> to vector<32x32xbf16>
    %222 = vector.shape_cast %221 : vector<32x32xbf16> to vector<2x16x32xbf16>
    %223 = arith.truncf %204 : vector<32x32xf32> to vector<32x32xbf16>
    %224 = vector.shape_cast %223 : vector<32x32xbf16> to vector<2x16x32xbf16>
    %225 = vector.extract_strided_slice %220 {offsets = [0, 0, 0], sizes = [2, 16, 16], strides = [1, 1, 1]} : vector<2x16x32xbf16> to vector<2x16x16xbf16>
    %226 = vector.extract_strided_slice %222 {offsets = [0, 0, 0], sizes = [2, 16, 16], strides = [1, 1, 1]} : vector<2x16x32xbf16> to vector<2x16x16xbf16>
    "tpu.trace_start"() <{level = 10 : i32, message = "bqd,bkd->bqk"}> : () -> ()
    %cst_91 = arith.constant dense<0.000000e+00> : vector<2x16x16xf32>
    %227 = tpu.matmul %225, %226, %cst_91 {dimension_numbers = #tpu.dot_dimension_numbers<[2], [2], [1], [1], [0, 0, 0, 1, 1, 1], [0], [0]>} : vector<2x16x16xbf16>, vector<2x16x16xbf16>, vector<2x16x16xf32> -> vector<2x16x16xf32>
    "tpu.trace_stop"() : () -> ()
    %cst_92 = arith.constant 2.500000e-01 : f32
    %228 = vector.broadcast %cst_92 : f32 to vector<2x16x16xf32>
    %229 = arith.mulf %227, %228 : vector<2x16x16xf32>
    %230 = arith.addf %229, %182 : vector<2x16x16xf32>
    %cst_93 = arith.constant dense<0xFF800000> : vector<2x16xf32>
    %231 = vector.multi_reduction <maximumf>, %230, %cst_93 [2] : vector<2x16x16xf32> to vector<2x16xf32>
    %232 = vector.shape_cast %231 : vector<2x16xf32> to vector<2x16x1xf32>
    %233 = vector.broadcast %232 : vector<2x16x1xf32> to vector<2x16x16xf32>
    %234 = arith.subf %230, %233 : vector<2x16x16xf32>
    %235 = math.exp %234 : vector<2x16x16xf32>
    %cst_94 = arith.constant dense<0.000000e+00> : vector<2x16xf32>
    %236 = vector.multi_reduction <add>, %235, %cst_94 [2] : vector<2x16x16xf32> to vector<2x16xf32>
    %237 = vector.shape_cast %236 : vector<2x16xf32> to vector<2x16x1xf32>
    %238 = tpu.reciprocal %237 {approx = true} : vector<2x16x1xf32> -> vector<2x16x1xf32>
    %239 = vector.broadcast %238 : vector<2x16x1xf32> to vector<2x16x16xf32>
    %240 = arith.mulf %235, %239 : vector<2x16x16xf32>
    %241 = arith.truncf %240 : vector<2x16x16xf32> to vector<2x16x16xbf16>
    %242 = vector.extract_strided_slice %224 {offsets = [0, 0, 0], sizes = [2, 16, 16], strides = [1, 1, 1]} : vector<2x16x32xbf16> to vector<2x16x16xbf16>
    "tpu.trace_start"() <{level = 10 : i32, message = "bqk,bkd->bqd"}> : () -> ()
    %cst_95 = arith.constant dense<0.000000e+00> : vector<2x16x16xf32>
    %243 = tpu.matmul %241, %242, %cst_95 {dimension_numbers = #tpu.dot_dimension_numbers<[2], [1], [1], [2], [0, 0, 0, 1, 1, 2], [0], [0]>} : vector<2x16x16xbf16>, vector<2x16x16xbf16>, vector<2x16x16xf32> -> vector<2x16x16xf32>
    "tpu.trace_stop"() : () -> ()
    %244 = vector.extract_strided_slice %220 {offsets = [0, 0, 16], sizes = [2, 16, 16], strides = [1, 1, 1]} : vector<2x16x32xbf16> to vector<2x16x16xbf16>
    %245 = vector.extract_strided_slice %222 {offsets = [0, 0, 16], sizes = [2, 16, 16], strides = [1, 1, 1]} : vector<2x16x32xbf16> to vector<2x16x16xbf16>
    "tpu.trace_start"() <{level = 10 : i32, message = "bqd,bkd->bqk"}> : () -> ()
    %cst_96 = arith.constant dense<0.000000e+00> : vector<2x16x16xf32>
    %246 = tpu.matmul %244, %245, %cst_96 {dimension_numbers = #tpu.dot_dimension_numbers<[2], [2], [1], [1], [0, 0, 0, 1, 1, 1], [0], [0]>} : vector<2x16x16xbf16>, vector<2x16x16xbf16>, vector<2x16x16xf32> -> vector<2x16x16xf32>
    "tpu.trace_stop"() : () -> ()
    %cst_97 = arith.constant 2.500000e-01 : f32
    %247 = vector.broadcast %cst_97 : f32 to vector<2x16x16xf32>
    %248 = arith.mulf %246, %247 : vector<2x16x16xf32>
    %249 = arith.addf %248, %182 : vector<2x16x16xf32>
    %cst_98 = arith.constant dense<0xFF800000> : vector<2x16xf32>
    %250 = vector.multi_reduction <maximumf>, %249, %cst_98 [2] : vector<2x16x16xf32> to vector<2x16xf32>
    %251 = vector.shape_cast %250 : vector<2x16xf32> to vector<2x16x1xf32>
    %252 = vector.broadcast %251 : vector<2x16x1xf32> to vector<2x16x16xf32>
    %253 = arith.subf %249, %252 : vector<2x16x16xf32>
    %254 = math.exp %253 : vector<2x16x16xf32>
    %cst_99 = arith.constant dense<0.000000e+00> : vector<2x16xf32>
    %255 = vector.multi_reduction <add>, %254, %cst_99 [2] : vector<2x16x16xf32> to vector<2x16xf32>
    %256 = vector.shape_cast %255 : vector<2x16xf32> to vector<2x16x1xf32>
    %257 = tpu.reciprocal %256 {approx = true} : vector<2x16x1xf32> -> vector<2x16x1xf32>
    %258 = vector.broadcast %257 : vector<2x16x1xf32> to vector<2x16x16xf32>
    %259 = arith.mulf %254, %258 : vector<2x16x16xf32>
    %260 = arith.truncf %259 : vector<2x16x16xf32> to vector<2x16x16xbf16>
    %261 = vector.extract_strided_slice %224 {offsets = [0, 0, 16], sizes = [2, 16, 16], strides = [1, 1, 1]} : vector<2x16x32xbf16> to vector<2x16x16xbf16>
    "tpu.trace_start"() <{level = 10 : i32, message = "bqk,bkd->bqd"}> : () -> ()
    %cst_100 = arith.constant dense<0.000000e+00> : vector<2x16x16xf32>
    %262 = tpu.matmul %260, %261, %cst_100 {dimension_numbers = #tpu.dot_dimension_numbers<[2], [1], [1], [2], [0, 0, 0, 1, 1, 2], [0], [0]>} : vector<2x16x16xbf16>, vector<2x16x16xbf16>, vector<2x16x16xf32> -> vector<2x16x16xf32>
    "tpu.trace_stop"() : () -> ()
    %263 = tpu.concatenate %243, %262 in 2 : vector<2x16x16xf32>, vector<2x16x16xf32> -> vector<2x16x32xf32>
    %264 = vector.shape_cast %263 : vector<2x16x32xf32> to vector<32x32xf32>
    %c0_101 = arith.constant 0 : index
    %c0_102 = arith.constant 0 : index
    %265 = vector.load %arg11[%c0_101, %c0_102] : memref<32x32xbf16, #tpu.memory_space<vmem>>, vector<32x32xbf16>
    %266 = arith.truncf %264 : vector<32x32xf32> to vector<32x32xbf16>
    %cst_103 = arith.constant dense<0.000000e+00> : vector<32x32xf32>
    %267 = tpu.matmul %266, %265, %cst_103 {dimension_numbers = #tpu.dot_dimension_numbers<[1], [0], [0], [1], [0, 0, 1, 1], [], []>} : vector<32x32xbf16>, vector<32x32xbf16>, vector<32x32xf32> -> vector<32x32xf32>
    %268 = arith.addf %163, %267 : vector<32x32xf32>
    %c12 = arith.constant 12 : index
    %c0_104 = arith.constant 0 : index
    %269 = vector.load %arg16[%c12, %c0_104] : memref<64x128xf32, #tpu.memory_space<vmem>>, vector<1x32xf32>
    %270 = arith.mulf %268, %268 : vector<32x32xf32>
    %cst_105 = arith.constant dense<0.000000e+00> : vector<32xf32>
    %271 = vector.multi_reduction <add>, %270, %cst_105 [1] : vector<32x32xf32> to vector<32xf32>
    %272 = vector.shape_cast %271 : vector<32xf32> to vector<32x1xf32>
    %cst_106 = arith.constant 3.200000e+01 : f32
    %273 = vector.broadcast %cst_106 : f32 to vector<32x1xf32>
    %274 = arith.divf %272, %273 : vector<32x1xf32>
    %cst_107 = arith.constant 9.99999997E-7 : f32
    %275 = vector.broadcast %cst_107 : f32 to vector<32x1xf32>
    %276 = arith.addf %274, %275 : vector<32x1xf32>
    %277 = math.rsqrt %276 : vector<32x1xf32>
    %278 = vector.broadcast %277 : vector<32x1xf32> to vector<32x32xf32>
    %279 = arith.mulf %268, %278 : vector<32x32xf32>
    %280 = vector.broadcast %269 : vector<1x32xf32> to vector<32x32xf32>
    %281 = arith.mulf %279, %280 : vector<32x32xf32>
    %c0_108 = arith.constant 0 : index
    %c0_109 = arith.constant 0 : index
    %282 = vector.load %arg12[%c0_108, %c0_109] : memref<32x128xbf16, #tpu.memory_space<vmem>>, vector<32x128xbf16>
    %283 = arith.truncf %281 : vector<32x32xf32> to vector<32x32xbf16>
    %cst_110 = arith.constant dense<0.000000e+00> : vector<32x128xf32>
    %284 = tpu.matmul %283, %282, %cst_110 {dimension_numbers = #tpu.dot_dimension_numbers<[1], [0], [0], [1], [0, 0, 1, 1], [], []>} : vector<32x32xbf16>, vector<32x128xbf16>, vector<32x128xf32> -> vector<32x128xf32>
    %285 = vector.extract_strided_slice %284 {offsets = [0, 0], sizes = [32, 64], strides = [1, 1]} : vector<32x128xf32> to vector<32x64xf32>
    %286 = arith.negf %285 : vector<32x64xf32>
    %287 = math.exp %286 : vector<32x64xf32>
    %cst_111 = arith.constant 1.000000e+00 : f32
    %288 = vector.broadcast %cst_111 : f32 to vector<32x64xf32>
    %289 = arith.addf %288, %287 : vector<32x64xf32>
    %290 = arith.divf %288, %289 : vector<32x64xf32>
    %291 = arith.mulf %285, %290 : vector<32x64xf32>
    %292 = vector.extract_strided_slice %284 {offsets = [0, 64], sizes = [32, 64], strides = [1, 1]} : vector<32x128xf32> to vector<32x64xf32>
    %293 = arith.mulf %291, %292 : vector<32x64xf32>
    %c0_112 = arith.constant 0 : index
    %c0_113 = arith.constant 0 : index
    %294 = vector.load %arg13[%c0_112, %c0_113] : memref<64x32xbf16, #tpu.memory_space<vmem>>, vector<64x32xbf16>
    %295 = arith.truncf %293 : vector<32x64xf32> to vector<32x64xbf16>
    %cst_114 = arith.constant dense<0.000000e+00> : vector<32x32xf32>
    %296 = tpu.matmul %295, %294, %cst_114 {dimension_numbers = #tpu.dot_dimension_numbers<[1], [0], [0], [1], [0, 0, 1, 1], [], []>} : vector<32x64xbf16>, vector<64x32xbf16>, vector<32x32xf32> -> vector<32x32xf32>
    %297 = arith.addf %268, %296 : vector<32x32xf32>
    %c13 = arith.constant 13 : index
    %c0_115 = arith.constant 0 : index
    %298 = vector.load %arg16[%c13, %c0_115] : memref<64x128xf32, #tpu.memory_space<vmem>>, vector<1x32xf32>
    %299 = arith.mulf %297, %297 : vector<32x32xf32>
    %cst_116 = arith.constant dense<0.000000e+00> : vector<32xf32>
    %300 = vector.multi_reduction <add>, %299, %cst_116 [1] : vector<32x32xf32> to vector<32xf32>
    %301 = vector.shape_cast %300 : vector<32xf32> to vector<32x1xf32>
    %cst_117 = arith.constant 3.200000e+01 : f32
    %302 = vector.broadcast %cst_117 : f32 to vector<32x1xf32>
    %303 = arith.divf %301, %302 : vector<32x1xf32>
    %cst_118 = arith.constant 9.99999997E-7 : f32
    %304 = vector.broadcast %cst_118 : f32 to vector<32x1xf32>
    %305 = arith.addf %303, %304 : vector<32x1xf32>
    %306 = math.rsqrt %305 : vector<32x1xf32>
    %307 = vector.broadcast %306 : vector<32x1xf32> to vector<32x32xf32>
    %308 = arith.mulf %297, %307 : vector<32x32xf32>
    %309 = vector.broadcast %298 : vector<1x32xf32> to vector<32x32xf32>
    %310 = arith.mulf %308, %309 : vector<32x32xf32>
    %c0_119 = arith.constant 0 : index
    %c0_120 = arith.constant 0 : index
    %311 = vector.load %arg14[%c0_119, %c0_120] : memref<32x128xbf16, #tpu.memory_space<vmem>>, vector<32x128xbf16>
    %312 = arith.truncf %310 : vector<32x32xf32> to vector<32x32xbf16>
    %cst_121 = arith.constant dense<0.000000e+00> : vector<32x128xf32>
    %313 = tpu.matmul %312, %311, %cst_121 {dimension_numbers = #tpu.dot_dimension_numbers<[1], [0], [0], [1], [0, 0, 1, 1], [], []>} : vector<32x32xbf16>, vector<32x128xbf16>, vector<32x128xf32> -> vector<32x128xf32>
    %c0_122 = arith.constant 0 : index
    %c0_123 = arith.constant 0 : index
    %314 = vector.load %arg17[%c0_122, %c0_123] : memref<32x128xf32, #tpu.memory_space<vmem>>, vector<32x128xf32>
    tpu.vector_store %arg17[%c0_122, %c0_123], %313 {strides = array<i32>} : memref<32x128xf32, #tpu.memory_space<vmem>>, vector<32x128xf32>,
    return
  }
}

</mosaic_0001>

<bundles_post_ra>
// kernel: multimodal_forward.1
= control target key start
LH: loop header
LB: loop body
LE: loop exit
PB: predicated region body
PF: predicated region fallthrough
CT: control target
= control target key end

     0   :  { %s4628_s0 = inlined_call_operand.vmem [shape: f32[16,192], index: 0, kind: input, shape index: {}]   ;;  %s4629_s1 = inlined_call_operand.vmem [shape: s32[16,1], index: 1, kind: input, shape index: {}]   ;;  %s4630_s2 = inlined_call_operand.vmem [shape: s32[2,16], index: 2, kind: input, shape index: {}]   ;;  %s4631_s3 = inlined_call_operand.vmem [shape: bf16[192,24], index: 3, kind: input, shape index: {}]   ;;  %s4632_s4 = inlined_call_operand.vmem [shape: bf16[24,72], index: 4, kind: input, shape index: {}]   ;;  %s4633_s5 = inlined_call_operand.vmem [shape: bf16[24,24], index: 5, kind: input, shape index: {}]   ;;  %s4634_s6 = inlined_call_operand.vmem [shape: bf16[24,48], index: 6, kind: input, shape index: {}]   ;;  %s4635_s7 = inlined_call_operand.vmem [shape: bf16[48,24], index: 7, kind: input, shape index: {}]   ;;  %s4636_s8 = inlined_call_operand.vmem [shape: bf16[24,32], index: 8, kind: input, shape index: {}]   ;;  %s4637_s9 = inlined_call_operand.vmem [shape: bf16[128,32], index: 9, kind: input, shape index: {}]   ;;  %s4638_s10 = inlined_call_operand.vmem [shape: bf16[32,96], index: 10, kind: input, shape index: {}]   ;;  %s4639_s11 = inlined_call_operand.vmem [shape: bf16[32,32], index: 11, kind: input, shape index: {}]   ;;  %s4640_s12 = inlined_call_operand.vmem [shape: bf16[32,128], index: 12, kind: input, shape index: {}]   ;;  %s4641_s13 = inlined_call_operand.vmem [shape: bf16[64,32], index: 13, kind: input, shape index: {}]   ;;  %s4642_s14 = inlined_call_operand.vmem [shape: bf16[32,128], index: 14, kind: input, shape index: {}]   ;;  %s4643_s15 = inlined_call_operand.vmem [shape: bf16[32,32], index: 15, kind: input, shape index: {}]   ;;  %s4644_s16 = inlined_call_operand.vmem [shape: f32[64,128], index: 16, kind: input, shape index: {}]   ;;  %s4645_s17 = inlined_call_operand.hbm [shape: f32[32,128], index: 17, kind: output, shape index: {}]  }
   0x1   :  { %4648 = sst [smem:[#allocation6_spill]] %s4628_s0 }
   0x2   :  { %4649 = sst [smem:[#allocation7_spill]] %s4629_s1 }
   0x3   :  { %v3640_v0 = vld [vmem:[%s4631_s3] sm:$0xff]   ;;  %v3825_v1 = vmov 0   ;;  %v3641_v2 = vld [vmem:[%s4631_s3 + $0x8] sm:$0xff]   ;;  %v3642_v3 = vld [vmem:[%s4631_s3 + $0x10] sm:$0xff]   ;;  %s4650_s1 = sld [smem:[#allocation6_spill]]  ;;  %vm165_vm0 = vcmask 523264  }
   0x4   :  { %169 = vmatprep.subr.bf16.mxu0 %v3825_v1  ;;  %3629 = vset.pattern.permute.xlu1 %v3825_v1  ;;  %v3643_v4 = vld [vmem:[%s4631_s3 + $0x18] sm:$0xff]   ;;  %v3644_v7 = vld [vmem:[%s4631_s3 + $0x20] sm:$0xff]   ;;  %v3645_v9 = vld [vmem:[%s4631_s3 + $0x28] sm:$0xff]  }
   0x5   :  { %170 = vmatpush1.bf16.msra.mxu0 %v3640_v0  ;;  %3628 = vset.pattern.permute.xlu0 %v3825_v1  ;;  %v3646_v10 = vld [vmem:[%s4631_s3 + $0x30] sm:$0xff]   ;;  %v3647_v11 = vld [vmem:[%s4631_s3 + $0x38] sm:$0xff]   ;;  %v3648_v12 = vld [vmem:[%s4631_s3 + $0x40] sm:$0xff]  }
   0x6   :  { %171 = vmatprep.subr.bf16.mxu0 %v3825_v1  ;;  %v3649_v13 = vld [vmem:[%s4631_s3 + $0x48] sm:$0xff]  }
   0x9   :  { %172 = vmatpush1.bf16.msra.mxu0 %v3641_v2  ;;  %v59_v5 = vld [vmem:[%s4650_s1 + $0x8] sm:$0xff]  ;;  %v61_v6 = vld [vmem:[%s4650_s1 + $0x18] sm:$0xff] }
   0xa   :  { %173 = vmatprep.subr.bf16.mxu0 %v3825_v1  ;;  %v87_v8 = vpack.c.bf16 %v61_v6, %v59_v5 }
   0xc   :  { %3134 = vmatprep.mubr.msk.bf16.mxu0 %vm165_vm0, %v87_v8 }
   0xd   :  { %174 = vmatpush1.bf16.msra.mxu0 %v3642_v3 }
   0xe   :  { %175 = vmatprep.subr.bf16.mxu0 %v3825_v1 }
  0x11   :  { %176 = vmatpush1.bf16.msra.mxu0 %v3643_v4 }
  0x12   :  { %177 = vmatprep.subr.bf16.mxu0 %v3825_v1 }
  0x15   :  { %178 = vmatpush1.bf16.msra.mxu0 %v3644_v7 }
  0x16   :  { %179 = vmatprep.subr.bf16.mxu0 %v3825_v1 }
  0x19   :  { %180 = vmatpush1.bf16.msra.mxu0 %v3645_v9 }
  0x1a   :  { %181 = vmatprep.subr.bf16.mxu0 %v3825_v1 }
  0x1d   :  { %182 = vmatpush1.bf16.msra.mxu0 %v3646_v10 }
  0x1e   :  { %183 = vmatprep.subr.bf16.mxu0 %v3825_v1 }
  0x21   :  { %184 = vmatpush1.bf16.msra.mxu0 %v3647_v11 }
  0x22   :  { %185 = vmatprep.subr.bf16.mxu0 %v3825_v1 }
  0x25   :  { %186 = vmatpush1.bf16.msra.mxu0 %v3648_v12 }
  0x26   :  { %22 = vsyncpa [#allocation4], 0  ;;  %187 = vmatprep.subr.bf16.mxu0 %v3825_v1  ;;  %v3650_v14 = vld [vmem:[%s4631_s3 + $0x50] sm:$0xff]   ;;  %v3651_v15 = vld [vmem:[%s4631_s3 + $0x58] sm:$0xff]   ;;  %vm216_vm1 = vcmask 195584   ;;  %vm277_vm2 = vcmask 1043456  }
  0x27   :  { %v58_v16 = vld [vmem:[%s4650_s1] sm:$0xff]  ;;  %v60_v17 = vld [vmem:[%s4650_s1 + $0x10] sm:$0xff]  ;;  %v211_v25 = vld [vmem:[%s4644_s16 + $0x18] sm:$0xff]  ;;  %v3826_v44 = vmov 0.0   ;;  %vm3827_vm3 = vmmov 0   ;;  %s3829_s27 = smov 104  }
  0x28   :  { %v86_v18 = vpack.c.bf16 %v60_v17, %v58_v16  ;;  %v3121_v19 = vld [vmem:[%s4644_s16] ss:$0 sm:$0xff]  ;;  %v210_v21 = vld [vmem:[%s4644_s16 + $0x10] sm:$0xff]  ;;  %v3653_v43 = vld [vmem:[%s4632_s4 + $0x8] ss:$0 sps:$4 sm:$0xff]   ;;  %3341 = vmatprep.subr.bf16.mxu1 %v3826_v44  ;;  %3345 = vmatprep.mubr.msk.bf16.mxu1 %vm3827_vm3, %v3826_v44  ;;  %vm350_vm4 = vcmask 97280  }
  0x29   :  { %188 = vmatpush1.bf16.msra.mxu0 %v3649_v13  ;;  %v3652_v42 = vld [vmem:[%s4632_s4] sm:$0xff]   ;;  %v279_v45 = vsel %vm277_vm2, %v3653_v43, 0  ;;  %v3828_v63 = vmov 1983009808   ;;  %vm566_vm5 = vcmask 27648   ;;  %s3830_s28 = smov 80  }
  0x2a   :  { %189 = vmatprep.subr.bf16.mxu0 %v3825_v1  ;;  %3342 = vmatpush3.bf16.msra.mxu1 %v3652_v42  ;;  %v3135_v54 = vld [vmem:[%s4644_s16 + $0x1] ss:$0 sm:$0xff]  ;;  %v3136_v58 = vld [vmem:[%s4644_s16 + $0x2] ss:$0 sm:$0xff]  ;;  %v326_v0 = vunpack.c.l.s4 %v3828_v63  ;;  %v3137_v4 = vld [vmem:[%s4644_s16 + $0x3] ss:$0 sm:$0xff] }
  0x2b   :  { %3343 = vmatprep.subr.bf16.mxu1 %v3826_v44  ;;  %vm621_vm6 = vcmask 1041408   ;;  %s3831_s29 = smov 92   ;;  %s3832_s0 = smov 116   ;;  %vm617_vm7 = vcmask 31744   ;;  %vm1498_vm8 = vcmask 392192   ;;  %vm1737_vm12 = vcmask 261120  }
  0x2c   :  { %v327_v2 = vunpack.c.0.s8 %v326_v0  ;;  %s3833_s30 = smov 68   ;;  %s3834_s1 = smov 12   ;;  %vm2137_vm13 = vcmask 130048  }
  0x2d   :  { %190 = vmatpush1.bf16.msra.mxu0 %v3650_v14  ;;  %s3837_s4 = smov 32   ;;  %s3843_s26 = smov [#allocation3]  }
  0x2e   :  { %191 = vmatprep.subr.bf16.mxu0 %v3825_v1  ;;  %3344 = vmatpush3.bf16.msra.mxu1 %v279_v45  ;;  %v328_v1 = vlaneseq }
  0x2f   :  { %3349 = vmatprep.subr.bf16.mxu1 %v3826_v44 }
  0x30   :  { %v4031_v3 = vshrl.u32 %v328_v1, 7 }
  0x31   :  { %192 = vmatpush1.bf16.msra.mxu0 %v3651_v15 }
  0x32   :  { %3379 = vmatprep.subr.bf16.mxu0 %v3826_v44  ;;  %v330_v10 = vsub.s32 %v327_v2, %v4031_v3 }
  0x34   :  { %202 = vmatmul.mubr.bf16.vlgmr.msra.gmra.mrb[0].mxu0 %v86_v18 }
  0x35   :  { %3381 = vmatprep.mubr.msk.bf16.mxu0 %vm3827_vm3, %v3826_v44 }
 0x107   :  { %v203_v20 = vpop.f32.mrb[0].mxu0 }
 0x108   :  { %v204_v22 = vadd.f32 %v3121_v19, %v203_v20  ;;  %v205_v23 = vpop.f32.mrb[1].mxu0 }
 0x109   :  { %v206_v24 = vpop.f32.mrb[2].mxu0 }
 0x10a   :  { %v3994_v26 = vadd.f32 %v210_v21, %v204_v22  ;;  %v207_v27 = vadd.f32 %v3121_v19, %v206_v24  ;;  %v208_v28 = vpop.f32.mrb[3].mxu0 }
 0x10c   :  { %v3996_v29 = vadd.f32 %v211_v25, %v207_v27  ;;  %v217_v30 = vsel %vm216_vm1, %v3994_v26, 0.0 }
 0x10d   :  { %218 = vadd.xlane.f32.xlu0 %v217_v30 }
 0x10e   :  { %v220_v31 = vsel %vm216_vm1, %v3996_v29, 0.0 }
 0x111   :  { %221 = vadd.xlane.f32.xlu0 %v220_v31 }
 0x19a   :  { %v219_v32 = vpop.xlane.xlu0 %218 }
 0x19b   :  { %v224_v33 = vmul.f32 0.041666668, %v219_v32 }
 0x19d   :  { %v226_v34 = vsub.f32 %v3994_v26, %v224_v33 }
 0x19e   :  { %v222_v35 = vpop.xlane.xlu0 %221 }
 0x19f   :  { %v225_v36 = vmul.f32 0.041666668, %v222_v35  ;;  %v228_v37 = vmul.f32 %v226_v34, %v226_v34 }
 0x1a1   :  { %v227_v38 = vsub.f32 %v3996_v29, %v225_v36  ;;  %v230_v39 = vsel %vm216_vm1, %v228_v37, 0.0 }
 0x1a2   :  { %231 = vadd.xlane.f32.xlu1 %v230_v39 }
 0x1a3   :  { %v229_v40 = vmul.f32 %v227_v38, %v227_v38 }
 0x1a5   :  { %v233_v41 = vsel %vm216_vm1, %v229_v40, 0.0 }
 0x1a6   :  { %234 = vadd.xlane.f32.xlu1 %v233_v41 }
 0x22f   :  { %v232_v46 = vpop.xlane.xlu1 %231 }
 0x230   :  { %v236_v47 = vmul.f32 0.041666668, %v232_v46 }
 0x232   :  { %v238_v48 = vadd.f32 1e-05, %v236_v47 }
 0x233   :  { %v235_v49 = vpop.xlane.xlu1 %234 }
 0x234   :  { %3685 = vrsqrt.f32 %v238_v48  ;;  %v237_v50 = vmul.f32 0.041666668, %v235_v49 }
 0x236   :  { %v239_v51 = vadd.f32 1e-05, %v237_v50 }
 0x238   :  { %3687 = vrsqrt.f32 %v239_v51 }
 0x23e   :  { %v3686_v52 = vpop.eup %3685 }
 0x23f   :  { %v242_v53 = vmul.f32 %v3686_v52, %v226_v34 }
 0x241   :  { %v248_v57 = vmul.f32 %v3135_v54, %v242_v53 }
 0x242   :  { %v3688_v55 = vpop.eup %3687 }
 0x243   :  { %v243_v56 = vmul.f32 %v3688_v55, %v227_v38  ;;  %v254_v60 = vadd.f32 %v3136_v58, %v248_v57 }
 0x245   :  { %v249_v59 = vmul.f32 %v3135_v54, %v243_v56 }
 0x247   :  { %v255_v61 = vadd.f32 %v3136_v58, %v249_v59 }
 0x249   :  { %v259_v62 = vpack.c.bf16 %v255_v61, %v254_v60 }
 0x24b   :  { %3346 = vmatmul.mubr.msk.bf16.vlgmr.msra.gmra.mrb[0].mxu1 %vm216_vm1, %v259_v62 }
 0x24c   :  { %3351 = vmatprep.mubr.msk.bf16.mxu1 %vm3827_vm3, %v3826_v44 }
 0x31e   :  { %v315_v5 = vpop.f32.mrb[0].mxu1 }
 0x31f   :  { %v3347_v6 = vpop.f32.mrb[1].mxu1  ;;  %v316_v8 = vadd.f32 %v3137_v4, %v315_v5 }
 0x320   :  { %v318_v7 = vpop.f32.mrb[2].mxu1 }
 0x321   :  { %v319_v9 = vadd.f32 %v3137_v4, %v318_v7  ;;  %v3348_v11 = vpop.f32.mrb[3].mxu1 }
 0x323   :  { %v322_v12 = vpack.c.bf16 %v319_v9, %v316_v8  ;;  %v3141_v13 = vpack.c.bf16 %v319_v9, %v319_v9 }
 0x325   :  { %v331_v14 = vrot.slane %v322_v12, %v330_v10  ;;  %v338_v17 = vrot.slane %v3141_v13, %v330_v10 }
 0x327   :  { %v339_v15 = vcombine.high %v331_v14, %v331_v14  ;;  %v4037_v16 = vrot.slane %v331_v14, %v330_v10  ;;  %v340_v19 = vcombine.high %v338_v17, %v338_v17  ;;  %v4043_v20 = vrot.slane %v338_v17, %v330_v10 }
 0x329   :  { %v4039_v18 = vrot.slane %v339_v15, %v330_v10  ;;  %348 = vrot.lane.b32.xlu0 %v4037_v16, %s3829_s27  ;;  %v4046_v21 = vrot.slane %v340_v19, %v330_v10 }
 0x32b   :  { %404 = vrot.lane.b32.xlu1 %v4039_v18, %s3829_s27 }
 0x32f   :  { %459 = vrot.lane.b32.xlu1 %v4043_v20, %s3829_s27 }
 0x333   :  { %514 = vrot.lane.b32.xlu1 %v4046_v21, %s3829_s27  ;;  %s4651_s27 = sld [smem:[#allocation7_spill]] }
 0x39b   :  { %v349_v22 = vpop.permute.xlu0 %348 }
 0x39c   :  { %v355_v23 = vsel %vm350_vm4, %v349_v22, 0 }
 0x39d   :  { %3350 = vmatpush3.bf16.xpose.msra.mxu1 %v355_v23  ;;  %v405_v24 = vpop.permute.xlu1 %404 }
 0x39e   :  { %3355 = vmatprep.subr.bf16.mxu1 %v3826_v44  ;;  %v410_v25 = vsel %vm350_vm4, %v405_v24, 0 }
 0x3a1   :  { %v460_v27 = vpop.permute.xlu1 %459 }
 0x3a2   :  { %v465_v28 = vsel %vm350_vm4, %v460_v27, 0 }
 0x3a4   :  { %3352 = vmatmul.mubr.msk.bf16.vlgmr.msra.gmra.mrb[4].mxu1 %vm350_vm4, %v331_v14 }
 0x3a5   :  { %3356 = vmatpush3.bf16.xpose.msra.mxu1 %v410_v25  ;;  %3357 = vmatprep.mubr.msk.bf16.mxu1 %vm3827_vm3, %v3826_v44  ;;  %v515_v30 = vpop.permute.xlu1 %514 }
 0x3a6   :  { %3361 = vmatprep.subr.bf16.mxu1 %v3826_v44  ;;  %v520_v31 = vsel %vm350_vm4, %v515_v30, 0 }
 0x3ac   :  { %3358 = vmatmul.mubr.msk.bf16.vlgmr.msra.gmra.mrb[8].mxu1 %vm350_vm4, %v339_v15 }
 0x3ad   :  { %3362 = vmatpush3.bf16.xpose.msra.mxu1 %v465_v28  ;;  %3363 = vmatprep.mubr.msk.bf16.mxu1 %vm3827_vm3, %v3826_v44 }
 0x3ae   :  { %3367 = vmatprep.subr.bf16.mxu1 %v3826_v44 }
 0x3b4   :  { %3364 = vmatmul.mubr.msk.bf16.vlgmr.msra.gmra.mrb[12].mxu1 %vm350_vm4, %v338_v17 }
 0x3b5   :  { %3368 = vmatpush3.bf16.xpose.msra.mxu1 %v520_v31  ;;  %3369 = vmatprep.mubr.msk.bf16.mxu1 %vm3827_vm3, %v3826_v44 }
 0x3b6   :  { %3373 = vmatprep.subr.bf16.mxu1 %v3826_v44 }
 0x3bc   :  { %3370 = vmatmul.mubr.msk.bf16.vlgmr.msra.gmra.mrb[16].mxu1 %vm350_vm4, %v340_v19 }
 0x3bd   :  { %3375 = vmatprep.mubr.msk.bf16.mxu1 %vm3827_vm3, %v3826_v44 }
 0x477   :  { %v391_v32 = vpop.f32.mrb[4].mxu1 }
 0x478   :  { %v562_v33 = vmul.f32 0.28867513, %v391_v32  ;;  %v3353_v34 = vpop.f32.mrb[5].mxu1 }
 0x479   :  { %v394_v35 = vpop.f32.mrb[6].mxu1 }
 0x47a   :  { %v3354_v36 = vpop.f32.mrb[7].mxu1  ;;  %v567_v37 = vsel %vm566_vm5, %v562_v33, -inf }
 0x47b   :  { %568 = vmax.xlane.f32.xlu0 %v567_v37 }
 0x47f   :  { %v446_v38 = vpop.f32.mrb[8].mxu1 }
 0x480   :  { %v563_v39 = vmul.f32 0.28867513, %v446_v38  ;;  %v3359_v40 = vpop.f32.mrb[9].mxu1 }
 0x481   :  { %v449_v41 = vpop.f32.mrb[10].mxu1 }
 0x482   :  { %v3360_v42 = vpop.f32.mrb[11].mxu1  ;;  %v570_v43 = vsel %vm566_vm5, %v563_v39, -inf }
 0x483   :  { %571 = vmax.xlane.f32.xlu1 %v570_v43 }
 0x487   :  { %v501_v45 = vpop.f32.mrb[12].mxu1 }
 0x488   :  { %v564_v46 = vmul.f32 0.28867513, %v501_v45  ;;  %v3365_v47 = vpop.f32.mrb[13].mxu1 }
 0x489   :  { %v504_v48 = vpop.f32.mrb[14].mxu1 }
 0x48a   :  { %v3366_v49 = vpop.f32.mrb[15].mxu1  ;;  %v573_v50 = vsel %vm566_vm5, %v564_v46, -inf }
 0x48b   :  { %574 = vmax.xlane.f32.xlu0 %v573_v50 }
 0x48f   :  { %v556_v51 = vpop.f32.mrb[16].mxu1 }
 0x490   :  { %v565_v52 = vmul.f32 0.28867513, %v556_v51  ;;  %v3371_v53 = vpop.f32.mrb[17].mxu1 }
 0x491   :  { %v559_v54 = vpop.f32.mrb[18].mxu1 }
 0x492   :  { %v3372_v55 = vpop.f32.mrb[19].mxu1  ;;  %v576_v56 = vsel %vm566_vm5, %v565_v52, -inf }
 0x493   :  { %577 = vmax.xlane.f32.xlu0 %v576_v56 }
 0x494   :  { %665 = vrot.lane.b32.xlu1 %v4039_v18, %s3830_s28 }
 0x498   :  { %713 = vrot.lane.b32.xlu1 %v4043_v20, %s3830_s28 }
 0x49c   :  { %761 = vrot.lane.b32.xlu1 %v4046_v21, %s3830_s28 }
 0x508   :  { %v569_v57 = vpop.xlane.xlu0 %568 }
 0x509   :  { %v579_v58 = vsub.f32 %v562_v33, %v569_v57 }
 0x50b   :  { %v583_v59 = vmul.f32 1.442695, %v579_v58 }
 0x50d   :  { %3689 = vpow2.f32 %v583_v59 }
 0x510   :  { %v572_v60 = vpop.xlane.xlu1 %571 }
 0x511   :  { %v580_v61 = vsub.f32 %v563_v39, %v572_v60 }
 0x513   :  { %v585_v62 = vmul.f32 1.442695, %v580_v61 }
 0x514   :  { %v666_v63 = vpop.permute.xlu1 %665 }
 0x515   :  { %3691 = vpow2.f32 %v585_v62  ;;  %v671_v0 = vsel %vm621_vm6, %v666_v63, 0 }
 0x516   :  { %3380 = vmatpush3.bf16.msra.mxu0 %v671_v0 }
 0x517   :  { %v3690_v2 = vpop.eup %3689  ;;  %3391 = vmatprep.subr.bf16.mxu0 %v3826_v44 }
 0x518   :  { %v591_v4 = vsel %vm566_vm5, %v3690_v2, 0.0  ;;  %v575_v7 = vpop.xlane.xlu0 %574  ;;  %v714_v19 = vpop.permute.xlu1 %713 }
 0x519   :  { %592 = vadd.xlane.f32.xlu0 %v591_v4  ;;  %v581_v8 = vsub.f32 %v564_v46, %v575_v7  ;;  %v719_v32 = vsel %vm621_vm6, %v714_v19, 0 }
 0x51b   :  { %v587_v9 = vmul.f32 1.442695, %v581_v8 }
 0x51c   :  { %v762_v23 = vpop.permute.xlu1 %761 }
 0x51d   :  { %3693 = vpow2.f32 %v587_v9  ;;  %v767_v36 = vsel %vm621_vm6, %v762_v23, 0 }
 0x51f   :  { %v3692_v5 = vpop.eup %3691 }
 0x520   :  { %v594_v6 = vsel %vm566_vm5, %v3692_v5, 0.0  ;;  %v578_v10 = vpop.xlane.xlu0 %577 }
 0x521   :  { %595 = vadd.xlane.f32.xlu1 %v594_v6  ;;  %v582_v11 = vsub.f32 %v565_v52, %v578_v10 }
 0x523   :  { %v589_v12 = vmul.f32 1.442695, %v582_v11 }
 0x525   :  { %3695 = vpow2.f32 %v589_v12 }
 0x527   :  { %v3694_v13 = vpop.eup %3693 }
 0x528   :  { %v597_v14 = vsel %vm566_vm5, %v3694_v13, 0.0 }
 0x52f   :  { %615 = vrot.lane.b32.xlu0 %v4037_v16, %s3830_s28  ;;  %v3696_v15 = vpop.eup %3695 }
 0x530   :  { %v600_v17 = vsel %vm566_vm5, %v3696_v15, 0.0 }
 0x532   :  { %861 = vrot.lane.b32.xlu1 %v4039_v18, %s3831_s29 }
 0x54e   :  { %598 = vadd.xlane.f32.xlu0 %v597_v14 }
 0x556   :  { %601 = vadd.xlane.f32.xlu1 %v600_v17 }
 0x564   :  { %811 = vrot.lane.b32.xlu0 %v4037_v16, %s3831_s29 }
 0x567   :  { %859 = vrot.lane.b32.xlu1 %v4039_v18, %s3832_s0 }
 0x568   :  { %809 = vrot.lane.b32.xlu0 %v4037_v16, %s3832_s0 }
 0x56b   :  { %961 = vrot.lane.b32.xlu1 %v4046_v21, %s3831_s29 }
 0x56c   :  { %911 = vrot.lane.b32.xlu0 %v4043_v20, %s3831_s29 }
 0x56f   :  { %959 = vrot.lane.b32.xlu1 %v4046_v21, %s3832_s0 }
 0x570   :  { %909 = vrot.lane.b32.xlu0 %v4043_v20, %s3832_s0 }
 0x5a6   :  { %v593_v22 = vpop.xlane.xlu0 %592 }
 0x5a7   :  { %3697 = vrcp.f32 %v593_v22 }
 0x5aa   :  { %v616_v24 = vpop.permute.xlu0 %615 }
 0x5ab   :  { %v623_v25 = vsel %vm621_vm6, %v616_v24, 0 }
 0x5ac   :  { %3374 = vmatpush3.bf16.msra.mxu1 %v623_v25 }
 0x5ad   :  { %3385 = vmatprep.subr.bf16.mxu1 %v3826_v44 }
 0x5ae   :  { %v596_v27 = vpop.xlane.xlu1 %595 }
 0x5af   :  { %3699 = vrcp.f32 %v596_v27 }
 0x5b1   :  { %v3698_v28 = vpop.eup %3697 }
 0x5b2   :  { %v607_v30 = vmul.f32 %v3698_v28, %v3690_v2  ;;  %v862_v38 = vpop.permute.xlu1 %861 }
 0x5b3   :  { %v867_v52 = vsel %vm350_vm4, %v862_v38, 0 }
 0x5b4   :  { %v611_v31 = vpack.c.bf16 %v607_v30, %v607_v30 }
 0x5b6   :  { %3376 = vmatmul.mubr.msk.bf16.vlgmr.msra.gmra.mrb[20].mxu1 %vm617_vm7, %v611_v31 }
 0x5b7   :  { %3386 = vmatpush3.bf16.msra.mxu1 %v719_v32  ;;  %3387 = vmatprep.mubr.msk.bf16.mxu1 %vm3827_vm3, %v3826_v44 }
 0x5b8   :  { %3397 = vmatprep.subr.bf16.mxu1 %v3826_v44 }
 0x5b9   :  { %v3700_v33 = vpop.eup %3699 }
 0x5ba   :  { %v608_v34 = vmul.f32 %v3700_v33, %v3692_v5 }
 0x5bc   :  { %v612_v35 = vpack.c.bf16 %v608_v34, %v608_v34 }
 0x5be   :  { %3382 = vmatmul.mubr.msk.bf16.vlgmr.msra.gmra.mrb[4].mxu0 %vm617_vm7, %v612_v35 }
 0x5bf   :  { %3392 = vmatpush3.bf16.msra.mxu0 %v767_v36  ;;  %3393 = vmatprep.mubr.msk.bf16.mxu0 %vm3827_vm3, %v3826_v44 }
 0x5c0   :  { %3403 = vmatprep.subr.bf16.mxu0 %v3826_v44 }
 0x5db   :  { %v599_v37 = vpop.xlane.xlu0 %598 }
 0x5dc   :  { %3701 = vrcp.f32 %v599_v37 }
 0x5df   :  { %v812_v40 = vpop.permute.xlu0 %811 }
 0x5e0   :  { %v817_v46 = vsel %vm350_vm4, %v812_v40, 0 }
 0x5e3   :  { %v602_v39 = vpop.xlane.xlu1 %601  ;;  %v810_v45 = vpop.permute.xlu0 %809 }
 0x5e4   :  { %3703 = vrcp.f32 %v602_v39 }
 0x5e6   :  { %v3702_v41 = vpop.eup %3701 }
 0x5e7   :  { %v609_v42 = vmul.f32 %v3702_v41, %v3694_v13  ;;  %v912_v49 = vpop.permute.xlu0 %911  ;;  %v860_v51 = vpop.permute.xlu1 %859 }
 0x5e8   :  { %v917_v53 = vsel %vm350_vm4, %v912_v49, 0 }
 0x5e9   :  { %v613_v43 = vpack.c.bf16 %v609_v42, %v609_v42 }
 0x5eb   :  { %3388 = vmatmul.mubr.msk.bf16.vlgmr.msra.gmra.mrb[24].mxu1 %vm617_vm7, %v613_v43  ;;  %v962_v54 = vpop.permute.xlu1 %961  ;;  %v910_v55 = vpop.permute.xlu0 %909 }
 0x5ec   :  { %3398 = vmatpush3.bf16.xpose.msra.mxu1 %v817_v46  ;;  %3399 = vmatprep.mubr.msk.bf16.mxu1 %vm3827_vm3, %v3826_v44  ;;  %v967_v56 = vsel %vm350_vm4, %v962_v54, 0 }
 0x5ed   :  { %3409 = vmatprep.subr.bf16.mxu1 %v3826_v44 }
 0x5ee   :  { %v3704_v47 = vpop.eup %3703 }
 0x5ef   :  { %v610_v48 = vmul.f32 %v3704_v47, %v3696_v15  ;;  %v960_v57 = vpop.permute.xlu1 %959 }
 0x5f1   :  { %v614_v50 = vpack.c.bf16 %v610_v48, %v610_v48 }
 0x5f3   :  { %3394 = vmatmul.mubr.msk.bf16.vlgmr.msra.gmra.mrb[8].mxu0 %vm617_vm7, %v614_v50  ;;  %3400 = vmatmul.mubr.msk.bf16.vlgmr.msra.gmra.mrb[28].mxu1 %vm350_vm4, %v810_v45 }
 0x5f4   :  { %3404 = vmatpush3.bf16.xpose.msra.mxu0 %v867_v52  ;;  %3410 = vmatpush3.bf16.xpose.msra.mxu1 %v917_v53 }
 0x5f5   :  { %3405 = vmatprep.mubr.msk.bf16.mxu0 %vm3827_vm3, %v3826_v44  ;;  %3411 = vmatprep.mubr.msk.bf16.mxu1 %vm3827_vm3, %v3826_v44 }
 0x5f6   :  { %3415 = vmatprep.subr.bf16.mxu0 %v3826_v44  ;;  %3421 = vmatprep.subr.bf16.mxu1 %v3826_v44 }
 0x5fb   :  { %3406 = vmatmul.mubr.msk.bf16.vlgmr.msra.gmra.mrb[12].mxu0 %vm350_vm4, %v860_v51  ;;  %3412 = vmatmul.mubr.msk.bf16.vlgmr.msra.gmra.mrb[32].mxu1 %vm350_vm4, %v910_v55 }
 0x5fc   :  { %3416 = vmatpush3.bf16.xpose.msra.mxu0 %v967_v56  ;;  %3417 = vmatprep.mubr.msk.bf16.mxu0 %vm3827_vm3, %v3826_v44 }
 0x5fd   :  { %3427 = vmatprep.subr.bf16.mxu0 %v3826_v44  ;;  %3423 = vmatprep.mubr.msk.bf16.mxu1 %vm3827_vm3, %v3826_v44 }
 0x603   :  { %3418 = vmatmul.mubr.msk.bf16.vlgmr.msra.gmra.mrb[16].mxu0 %vm350_vm4, %v960_v57 }
 0x604   :  { %3429 = vmatprep.mubr.msk.bf16.mxu0 %vm3827_vm3, %v3826_v44 }
 0x689   :  { %v4133_v58 = vpop.f32.mrb[20].mxu1 }
 0x68a   :  { %v3377_v59 = vpop.f32.mrb[21].mxu1 }
 0x68b   :  { %v662_v60 = vpop.f32.mrb[22].mxu1 }
 0x68c   :  { %v3378_v61 = vpop.f32.mrb[23].mxu1 }
 0x691   :  { %v4135_v62 = vpop.f32.mrb[4].mxu0 }
 0x692   :  { %v3383_v63 = vpop.f32.mrb[5].mxu0 }
 0x693   :  { %v710_v0 = vpop.f32.mrb[6].mxu0 }
 0x694   :  { %v3384_v2 = vpop.f32.mrb[7].mxu0 }
 0x6be   :  { %v4137_v4 = vpop.f32.mrb[24].mxu1 }
 0x6bf   :  { %v3389_v5 = vpop.f32.mrb[25].mxu1 }
 0x6c0   :  { %v758_v6 = vpop.f32.mrb[26].mxu1 }
 0x6c1   :  { %v3390_v7 = vpop.f32.mrb[27].mxu1 }
 0x6c6   :  { %v4139_v8 = vpop.f32.mrb[8].mxu0  ;;  %v853_v9 = vpop.f32.mrb[28].mxu1 }
 0x6c7   :  { %v1009_v10 = vmul.f32 0.28867513, %v853_v9  ;;  %v3395_v11 = vpop.f32.mrb[9].mxu0  ;;  %v3401_v12 = vpop.f32.mrb[29].mxu1 }
 0x6c8   :  { %v806_v13 = vpop.f32.mrb[10].mxu0  ;;  %v856_v14 = vpop.f32.mrb[30].mxu1 }
 0x6c9   :  { %v3396_v15 = vpop.f32.mrb[11].mxu0  ;;  %v3402_v17 = vpop.f32.mrb[31].mxu1  ;;  %v1013_v19 = vsel %vm566_vm5, %v1009_v10, -inf }
 0x6ca   :  { %1014 = vmax.xlane.f32.xlu0 %v1013_v19 }
 0x6ce   :  { %v903_v22 = vpop.f32.mrb[12].mxu0  ;;  %v953_v23 = vpop.f32.mrb[32].mxu1 }
 0x6cf   :  { %v1010_v24 = vmul.f32 0.28867513, %v903_v22  ;;  %v1011_v25 = vmul.f32 0.28867513, %v953_v23  ;;  %v3407_v27 = vpop.f32.mrb[13].mxu0  ;;  %v3413_v28 = vpop.f32.mrb[33].mxu1 }
 0x6d0   :  { %v906_v30 = vpop.f32.mrb[14].mxu0  ;;  %v956_v31 = vpop.f32.mrb[34].mxu1 }
 0x6d1   :  { %v3408_v32 = vpop.f32.mrb[15].mxu0  ;;  %v3414_v33 = vpop.f32.mrb[35].mxu1  ;;  %v1016_v34 = vsel %vm566_vm5, %v1010_v24, -inf  ;;  %v1019_v35 = vsel %vm566_vm5, %v1011_v25, -inf  ;;  %v3654_v31 = vld [vmem:[%s4633_s5] sm:$0xff]  }
 0x6d2   :  { %1017 = vmax.xlane.f32.xlu1 %v1016_v34  ;;  %1020 = vmax.xlane.f32.xlu0 %v1019_v35 }
 0x6d6   :  { %v1003_v36 = vpop.f32.mrb[16].mxu0 }
 0x6d7   :  { %v1012_v37 = vmul.f32 0.28867513, %v1003_v36  ;;  %v3419_v38 = vpop.f32.mrb[17].mxu0 }
 0x6d8   :  { %v1006_v39 = vpop.f32.mrb[18].mxu0 }
 0x6d9   :  { %v3420_v40 = vpop.f32.mrb[19].mxu0  ;;  %v1022_v41 = vsel %vm566_vm5, %v1012_v37, -inf }
 0x6da   :  { %1023 = vmax.xlane.f32.xlu0 %v1022_v41 }
 0x757   :  { %v1015_v42 = vpop.xlane.xlu0 %1014 }
 0x758   :  { %v1025_v43 = vsub.f32 %v1009_v10, %v1015_v42 }
 0x75a   :  { %v1029_v45 = vmul.f32 1.442695, %v1025_v43 }
 0x75c   :  { %3705 = vpow2.f32 %v1029_v45  ;;  %v3655_v45 = vld [vmem:[%s4633_s5 + $0x8] ss:$0 sps:$4 sm:$0xff]  }
 0x75f   :  { %v1018_v46 = vpop.xlane.xlu1 %1017  ;;  %v1021_v47 = vpop.xlane.xlu0 %1020 }
 0x760   :  { %v1026_v48 = vsub.f32 %v1010_v24, %v1018_v46  ;;  %v1027_v49 = vsub.f32 %v1011_v25, %v1021_v47  ;;  %v1298_v46 = vsel %vm277_vm2, %v3655_v45, 0  ;;  %v3659_v45 = vld [vmem:[%s4635_s7 + $0x8] sm:$0xff]  }
 0x762   :  { %v1031_v50 = vmul.f32 1.442695, %v1026_v48  ;;  %v1033_v51 = vmul.f32 1.442695, %v1027_v49 }
 0x764   :  { %3707 = vpow2.f32 %v1031_v50 }
 0x765   :  { %3709 = vpow2.f32 %v1033_v51 }
 0x766   :  { %v3706_v52 = vpop.eup %3705 }
 0x767   :  { %v1037_v53 = vsel %vm566_vm5, %v3706_v52, 0.0  ;;  %v1024_v59 = vpop.xlane.xlu0 %1023 }
 0x768   :  { %1038 = vadd.xlane.f32.xlu0 %v1037_v53  ;;  %v1028_v60 = vsub.f32 %v1012_v37, %v1024_v59 }
 0x76a   :  { %v1035_v61 = vmul.f32 1.442695, %v1028_v60 }
 0x76c   :  { %3711 = vpow2.f32 %v1035_v61 }
 0x76e   :  { %v3708_v54 = vpop.eup %3707 }
 0x76f   :  { %v3710_v55 = vpop.eup %3709  ;;  %v1040_v56 = vsel %vm566_vm5, %v3708_v54, 0.0 }
 0x770   :  { %1041 = vadd.xlane.f32.xlu1 %v1040_v56  ;;  %v1043_v57 = vsel %vm566_vm5, %v3710_v55, 0.0 }
 0x771   :  { %1044 = vadd.xlane.f32.xlu0 %v1043_v57 }
 0x776   :  { %v3712_v63 = vpop.eup %3711 }
 0x777   :  { %v1046_v0 = vsel %vm566_vm5, %v3712_v63, 0.0 }
 0x781   :  { %1109 = vrot.lane.b32.xlu1 %v4039_v18, %s3833_s30 }
 0x785   :  { %1157 = vrot.lane.b32.xlu1 %v4043_v20, %s3833_s30 }
 0x787   :  { %1061 = vrot.lane.b32.xlu0 %v4037_v16, %s3833_s30 }
 0x7a9   :  { %1047 = vadd.xlane.f32.xlu1 %v1046_v0 }
 0x7ba   :  { %1205 = vrot.lane.b32.xlu1 %v4046_v21, %s3833_s30  ;;  %s3842_s30 = smov 16  }
 0x7f5   :  { %v1039_v2 = vpop.xlane.xlu0 %1038 }
 0x7f6   :  { %3713 = vrcp.f32 %v1039_v2 }
 0x7fd   :  { %v1042_v5 = vpop.xlane.xlu1 %1041 }
 0x7fe   :  { %3715 = vrcp.f32 %v1042_v5  ;;  %v1045_v6 = vpop.xlane.xlu0 %1044 }
 0x7ff   :  { %3717 = vrcp.f32 %v1045_v6 }
 0x800   :  { %v3714_v18 = vpop.eup %3713 }
 0x801   :  { %v1053_v20 = vmul.f32 %v3714_v18, %v3706_v52  ;;  %v1110_v7 = vpop.permute.xlu1 %1109 }
 0x802   :  { %v1115_v16 = vsel %vm621_vm6, %v1110_v7, 0  ;;  %v1062_v9 = vpop.permute.xlu0 %1061 }
 0x803   :  { %v1067_v10 = vsel %vm621_vm6, %v1062_v9, 0  ;;  %3428 = vmatpush3.bf16.msra.mxu0 %v1115_v16  ;;  %v1057_v11 = vpack.c.bf16 %v1053_v20, %v1053_v20 }
 0x804   :  { %3422 = vmatpush3.bf16.msra.mxu1 %v1067_v10  ;;  %3439 = vmatprep.subr.bf16.mxu0 %v3826_v44 }
 0x805   :  { %v1158_v21 = vpop.permute.xlu1 %1157  ;;  %3433 = vmatprep.subr.bf16.mxu1 %v3826_v44 }
 0x806   :  { %v1163_v12 = vsel %vm621_vm6, %v1158_v21, 0 }
 0x807   :  { %3424 = vmatmul.mubr.msk.bf16.vlgmr.msra.gmra.mrb[36].mxu1 %vm617_vm7, %v1057_v11 }
 0x808   :  { %v3716_v13 = vpop.eup %3715  ;;  %3434 = vmatpush3.bf16.msra.mxu1 %v1163_v12  ;;  %3435 = vmatprep.mubr.msk.bf16.mxu1 %vm3827_vm3, %v3826_v44 }
 0x809   :  { %v3718_v14 = vpop.eup %3717  ;;  %v1054_v15 = vmul.f32 %v3716_v13, %v3708_v54  ;;  %3445 = vmatprep.subr.bf16.mxu1 %v3826_v44 }
 0x80a   :  { %v1055_v17 = vmul.f32 %v3718_v14, %v3710_v55 }
 0x80b   :  { %v1058_v19 = vpack.c.bf16 %v1054_v15, %v1054_v15  ;;  %v3656_v15 = vld [vmem:[%s4634_s6] sm:$0xff]  }
 0x80c   :  { %v1059_v22 = vpack.c.bf16 %v1055_v17, %v1055_v17  ;;  %v3657_v17 = vld [vmem:[%s4634_s6 + $0x8] ss:$0 sps:$4 sm:$0xff]  }
 0x80d   :  { %3430 = vmatmul.mubr.msk.bf16.vlgmr.msra.gmra.mrb[20].mxu0 %vm617_vm7, %v1058_v19  ;;  %v1412_v19 = vsel %vm277_vm2, %v3657_v17, 0 }
 0x80e   :  { %3441 = vmatprep.mubr.msk.bf16.mxu0 %vm3827_vm3, %v3826_v44 }
 0x80f   :  { %3436 = vmatmul.mubr.msk.bf16.vlgmr.msra.gmra.mrb[40].mxu1 %vm617_vm7, %v1059_v22  ;;  %v1618_v22 = vld [vmem:[%s4651_s27 + $0x8] sm:$0xff] }
 0x810   :  { %3449 = vmatprep.mubr.msk.bf16.mxu1 %vm3827_vm3, %v3826_v44  ;;  %3446 = vmatpush3.bf16.msra.mxu1 %v3654_v31 }
 0x811   :  { %3447 = vmatprep.subr.bf16.mxu1 %v3826_v44 }
 0x814   :  { %3448 = vmatpush3.bf16.msra.mxu1 %v1298_v46  ;;  %v3660_v46 = vld [vmem:[%s4635_s7 + $0x10] sm:$0xff]  }
 0x815   :  { %3461 = vmatprep.subr.bf16.mxu1 %v3826_v44 }
 0x836   :  { %v1048_v23 = vpop.xlane.xlu1 %1047 }
 0x837   :  { %3719 = vrcp.f32 %v1048_v23  ;;  %v1617_v23 = vld [vmem:[%s4651_s27] sm:$0xff]  ;;  %s3840_s27 = smov 112  }
 0x83a   :  { %v1206_v24 = vpop.permute.xlu1 %1205 }
 0x83b   :  { %v1211_v25 = vsel %vm621_vm6, %v1206_v24, 0 }
 0x83c   :  { %3440 = vmatpush3.bf16.msra.mxu0 %v1211_v25 }
 0x83d   :  { %3453 = vmatprep.subr.bf16.mxu0 %v3826_v44 }
 0x841   :  { %v3720_v27 = vpop.eup %3719 }
 0x842   :  { %v1056_v28 = vmul.f32 %v3720_v27, %v3712_v63 }
 0x844   :  { %v1060_v30 = vpack.c.bf16 %v1056_v28, %v1056_v28 }
 0x846   :  { %3442 = vmatmul.mubr.msk.bf16.vlgmr.msra.gmra.mrb[24].mxu0 %vm617_vm7, %v1060_v30 }
 0x847   :  { %3457 = vmatprep.mubr.msk.bf16.mxu0 %vm3827_vm3, %v3826_v44  ;;  %3454 = vmatpush3.bf16.msra.mxu0 %v3656_v15 }
 0x848   :  { %3455 = vmatprep.subr.bf16.mxu0 %v3826_v44 }
 0x84b   :  { %3456 = vmatpush3.bf16.msra.mxu0 %v1412_v19  ;;  %v3668_v19 = vld [vmem:[%s4637_s9 + $0x38] sm:$0xff]  }
 0x84c   :  { %3471 = vmatprep.subr.bf16.mxu0 %v3826_v44 }
 0x8da   :  { %v1103_v32 = vpop.f32.mrb[36].mxu1 }
 0x8db   :  { %1257 = vrot.lane.b32.xlu0 %v1103_v32, %s3834_s1  ;;  %v3425_v33 = vpop.f32.mrb[37].mxu1 }
 0x8dc   :  { %v1106_v34 = vpop.f32.mrb[38].mxu1 }
 0x8dd   :  { %v3426_v35 = vpop.f32.mrb[39].mxu1  ;;  %v3162_v34 = vld [vmem:[%s4644_s16 + $0x5] ss:$0 sm:$0xff] }
 0x8e0   :  { %v1151_v36 = vpop.f32.mrb[20].mxu0 }
 0x8e1   :  { %v3431_v37 = vpop.f32.mrb[21].mxu0  ;;  %1259 = vrot.lane.b32.xlu1 %v1151_v36, %s3834_s1 }
 0x8e2   :  { %v1199_v38 = vpop.f32.mrb[40].mxu1  ;;  %v1154_v39 = vpop.f32.mrb[22].mxu0 }
 0x8e3   :  { %1261 = vrot.lane.b32.xlu0 %v1199_v38, %s3834_s1  ;;  %v3437_v40 = vpop.f32.mrb[41].mxu1  ;;  %v3432_v41 = vpop.f32.mrb[23].mxu0  ;;  %v3163_v38 = vld [vmem:[%s4644_s16 + $0x6] ss:$0 sm:$0xff] }
 0x8e4   :  { %v1202_v42 = vpop.f32.mrb[42].mxu1 }
 0x8e5   :  { %v3438_v43 = vpop.f32.mrb[43].mxu1 }
 0x8e6   :  { %v3658_v43 = vld [vmem:[%s4635_s7] sm:$0xff]  }
 0x919   :  { %v1247_v47 = vpop.f32.mrb[24].mxu0 }
 0x91a   :  { %1263 = vrot.lane.b32.xlu1 %v1247_v47, %s3834_s1  ;;  %v3443_v48 = vpop.f32.mrb[25].mxu0  ;;  %v3164_v47 = vld [vmem:[%s4644_s16 + $0x7] ss:$0 sm:$0xff] }
 0x91b   :  { %v1250_v49 = vpop.f32.mrb[26].mxu0 }
 0x91c   :  { %v3444_v50 = vpop.f32.mrb[27].mxu0 }
 0x94d   :  { %v1258_v51 = vpop.permute.xlu0 %1257 }
 0x94e   :  { %v1269_v53 = vsel %vm350_vm4, %v4133_v58, %v1258_v51 }
 0x953   :  { %v1260_v52 = vpop.permute.xlu1 %1259 }
 0x954   :  { %v1270_v54 = vsel %vm350_vm4, %v4135_v62, %v1260_v52  ;;  %v3161_v62 = vld [vmem:[%s4644_s16 + $0x4] ss:$0 sm:$0xff] }
 0x955   :  { %v1280_v55 = vcombine.low %v1269_v53, %v1270_v54  ;;  %v1262_v56 = vpop.permute.xlu0 %1261 }
 0x956   :  { %v1271_v59 = vsel %vm350_vm4, %v4137_v4, %v1262_v56 }
 0x98c   :  { %v1264_v57 = vpop.permute.xlu1 %1263 }
 0x98d   :  { %v1272_v60 = vsel %vm350_vm4, %v4139_v8, %v1264_v57 }
 0x98e   :  { %v1281_v61 = vcombine.low %v1271_v59, %v1272_v60 }
 0x990   :  { %v1284_v63 = vpack.c.bf16 %v1281_v61, %v1280_v55 }
 0x992   :  { %3450 = vmatmul.mubr.msk.bf16.vlgmr.msra.gmra.mrb[44].mxu1 %vm216_vm1, %v1284_v63 }
 0x993   :  { %3467 = vmatprep.mubr.msk.bf16.mxu1 %vm3827_vm3, %v3826_v44  ;;  %3462 = vmatpush3.bf16.msra.mxu1 %v3658_v43 }
 0x994   :  { %3463 = vmatprep.subr.bf16.mxu1 %v3826_v44 }
 0x997   :  { %3464 = vmatpush3.bf16.msra.mxu1 %v3659_v45 }
 0x998   :  { %3465 = vmatprep.subr.bf16.mxu1 %v3826_v44 }
 0x99b   :  { %3466 = vmatpush3.bf16.msra.mxu1 %v3660_v46 }
 0x99c   :  { %3479 = vmatprep.subr.bf16.mxu1 %v3826_v44 }
 0xa65   :  { %v1334_v58 = vpop.f32.mrb[44].mxu1 }
 0xa66   :  { %v1341_v0 = vadd.f32 %v1334_v58, %v3994_v26  ;;  %v3451_v2 = vpop.f32.mrb[45].mxu1 }
 0xa67   :  { %v1337_v5 = vpop.f32.mrb[46].mxu1 }
 0xa68   :  { %v4197_v4 = vadd.f32 %v3161_v62, %v1341_v0  ;;  %v1342_v8 = vadd.f32 %v1337_v5, %v3996_v29  ;;  %v3452_v6 = vpop.f32.mrb[47].mxu1 }
 0xa6a   :  { %v4200_v18 = vadd.f32 %v3161_v62, %v1342_v8  ;;  %v1352_v20 = vsel %vm216_vm1, %v4197_v4, 0.0 }
 0xa6b   :  { %1353 = vadd.xlane.f32.xlu0 %v1352_v20 }
 0xa6c   :  { %v1355_v7 = vsel %vm216_vm1, %v4200_v18, 0.0 }
 0xa6d   :  { %1356 = vadd.xlane.f32.xlu1 %v1355_v7 }
 0xa7e   :  { %1625 = vperm.xlu1 %3629, %v1618_v22   ;;  %v3835_v22 = vmov 1.0|1.0  }
 0xaf8   :  { %v1354_v16 = vpop.xlane.xlu0 %1353 }
 0xaf9   :  { %v1358_v9 = vmul.f32 0.041666668, %v1354_v16 }
 0xafa   :  { %v1357_v26 = vpop.xlane.xlu1 %1356 }
 0xafb   :  { %v1360_v10 = vsub.f32 %v4197_v4, %v1358_v9  ;;  %v1359_v11 = vmul.f32 0.041666668, %v1357_v26  ;;  %v3661_v9 = vld [vmem:[%s4637_s9] sm:$0xff]  }
 0xafd   :  { %v1361_v21 = vsub.f32 %v4200_v18, %v1359_v11  ;;  %v1362_v29 = vmul.f32 %v1360_v10, %v1360_v10  ;;  %v3663_v11 = vld [vmem:[%s4637_s9 + $0x10] sm:$0xff]  }
 0xafe   :  { %v1626_v17 = vpop.permute.xlu1 %1625 }
 0xaff   :  { %v1364_v12 = vsel %vm216_vm1, %v1362_v29, 0.0  ;;  %v1363_v13 = vmul.f32 %v1361_v21, %v1361_v21  ;;  %v3665_v29 = vld [vmem:[%s4637_s9 + $0x20] sm:$0xff]  }
 0xb00   :  { %1365 = vadd.xlane.f32.xlu0 %v1364_v12  ;;  %v3666_v12 = vld [vmem:[%s4637_s9 + $0x28] sm:$0xff]  }
 0xb01   :  { %v1367_v14 = vsel %vm216_vm1, %v1363_v13, 0.0  ;;  %v3667_v13 = vld [vmem:[%s4637_s9 + $0x30] sm:$0xff]  }
 0xb04   :  { %1368 = vadd.xlane.f32.xlu0 %v1367_v14  ;;  %v4279_v14 = vand.u32 127, %v328_v1  ;;  %v3669_v1 = vld [vmem:[%s4636_s8] sm:$0xff]  }
 0xb06   :  { %vm1628_vm10 = vcmp.eq.s32.totalorder %v4279_v14, %v1626_v17  ;;  %vm1749_vm15 = vcmp.le.s32.totalorder %v4279_v14, %v4031_v3 }
 0xb1a   :  { %1622 = vperm.xlu0 %3628, %v1617_v23   ;;  %v3670_v23 = vld [vmem:[%s4636_s8 + $0x8] ss:$0 sps:$4 sm:$0xff]  }
 0xb8d   :  { %v1366_v24 = vpop.xlane.xlu0 %1365 }
 0xb8e   :  { %v1370_v25 = vmul.f32 0.041666668, %v1366_v24  ;;  %v1574_v24 = vsel %vm277_vm2, %v3670_v23, 0 }
 0xb90   :  { %v1372_v27 = vadd.f32 1e-05, %v1370_v25 }
 0xb91   :  { %v1369_v28 = vpop.xlane.xlu0 %1368 }
 0xb92   :  { %3721 = vrsqrt.f32 %v1372_v27  ;;  %v1371_v30 = vmul.f32 0.041666668, %v1369_v28 }
 0xb94   :  { %v1373_v31 = vadd.f32 1e-05, %v1371_v30  ;;  %v3172_v30 = vld [vmem:[%s4644_s16 + $0x8] ss:$0 sm:$0xff] }
 0xb96   :  { %3723 = vrsqrt.f32 %v1373_v31 }
 0xb99   :  { %v1623_v15 = vpop.permute.xlu0 %1622 }
 0xb9a   :  { %vm1627_vm9 = vcmp.eq.s32.totalorder %v4279_v14, %v1623_v15 }
 0xb9b   :  { %vm3185_vm11 = vmpackc.low %vm1628_vm10, %vm1627_vm9 }
 0xb9c   :  { %v3722_v32 = vpop.eup %3721 }
 0xb9d   :  { %v1376_v33 = vmul.f32 %v3722_v32, %v1360_v10  ;;  %v3662_v10 = vld [vmem:[%s4637_s9 + $0x8] sm:$0xff]  }
 0xb9f   :  { %v1382_v36 = vmul.f32 %v3162_v34, %v1376_v33 }
 0xba0   :  { %v3724_v35 = vpop.eup %3723 }
 0xba1   :  { %v1377_v37 = vmul.f32 %v3724_v35, %v1361_v21  ;;  %v1388_v40 = vadd.f32 %v3163_v38, %v1382_v36  ;;  %v3664_v21 = vld [vmem:[%s4637_s9 + $0x18] sm:$0xff]  }
 0xba3   :  { %v1383_v39 = vmul.f32 %v3162_v34, %v1377_v37 }
 0xba5   :  { %v1389_v41 = vadd.f32 %v3163_v38, %v1383_v39 }
 0xba7   :  { %v1393_v42 = vpack.c.bf16 %v1389_v41, %v1388_v40 }
 0xba9   :  { %3458 = vmatmul.mubr.msk.bf16.vlgmr.msra.gmra.mrb[28].mxu0 %vm216_vm1, %v1393_v42  ;;  %v3173_v42 = vld [vmem:[%s4644_s16 + $0x9] ss:$0 sm:$0xff] }
 0xbaa   :  { %3475 = vmatprep.mubr.msk.bf16.mxu0 %vm3827_vm3, %v3826_v44  ;;  %3472 = vmatpush3.bf16.msra.mxu0 %v3669_v1 }
 0xbab   :  { %3473 = vmatprep.subr.bf16.mxu0 %v3826_v44 }
 0xbae   :  { %3474 = vmatpush3.bf16.msra.mxu0 %v1574_v24 }
 0xc7c   :  { %v1448_v48 = vpop.f32.mrb[28].mxu0 }
 0xc7d   :  { %v1449_v49 = vadd.f32 %v3164_v47, %v1448_v48  ;;  %v3459_v50 = vpop.f32.mrb[29].mxu0 }
 0xc7e   :  { %v1451_v51 = vpop.f32.mrb[30].mxu0 }
 0xc7f   :  { %v1455_v52 = vmul.f32 %v1449_v49, %v1449_v49  ;;  %v1452_v53 = vadd.f32 %v3164_v47, %v1451_v51  ;;  %v3460_v54 = vpop.f32.mrb[31].mxu0 }
 0xc81   :  { %v1457_v55 = vmul.f32 %v1455_v52, %v1449_v49  ;;  %v1456_v56 = vmul.f32 %v1452_v53, %v1452_v53 }
 0xc83   :  { %v1459_v57 = vmul.f32 0.044715, %v1457_v55  ;;  %v1458_v59 = vmul.f32 %v1456_v56, %v1452_v53 }
 0xc85   :  { %v1461_v60 = vadd.f32 %v1459_v57, %v1449_v49  ;;  %v1460_v61 = vmul.f32 0.044715, %v1458_v59 }
 0xc87   :  { %v1463_v63 = vmul.f32 0.7978846, %v1461_v60  ;;  %v1462_v58 = vadd.f32 %v1460_v61, %v1452_v53  ;;  %v3671_v60 = vld [vmem:[%s4638_s10] sm:$0xff]   ;;  %v3672_v61 = vld [vmem:[%s4638_s10 + $0x8] sm:$0xff]  }
 0xc88   :  { %3499 = vmatprep.subr.bf16.mxu0 %v3671_v60 }
 0xc89   :  { %3725 = vtanh.f32 %v1463_v63  ;;  %v1464_v62 = vmul.f32 0.7978846, %v1462_v58 }
 0xc8b   :  { %3727 = vtanh.f32 %v1464_v62 }
 0xc93   :  { %v3726_v0 = vpop.eup %3725 }
 0xc94   :  { %v1467_v2 = vadd.f32 1.0, %v3726_v0 }
 0xc95   :  { %v3728_v5 = vpop.eup %3727 }
 0xc96   :  { %v1469_v8 = vmul.f32 0.5, %v1467_v2  ;;  %v1468_v6 = vadd.f32 1.0, %v3728_v5 }
 0xc98   :  { %v1470_v20 = vmul.f32 0.5, %v1468_v6  ;;  %v1471_v7 = vmul.f32 %v1469_v8, %v1449_v49 }
 0xc9a   :  { %v1472_v16 = vmul.f32 %v1470_v20, %v1452_v53 }
 0xc9c   :  { %v1479_v26 = vpack.c.bf16 %v1472_v16, %v1471_v7 }
 0xc9e   :  { %3468 = vmatmul.mubr.msk.bf16.vlgmr.msra.gmra.mrb[48].mxu1 %vm1498_vm8, %v1479_v26 }
 0xc9f   :  { %3480 = vmatpush3.bf16.msra.mxu1 %v3661_v9  ;;  %3495 = vmatprep.mubr.msk.bf16.mxu1 %vm3827_vm3, %v3826_v44 }
 0xca0   :  { %3481 = vmatprep.subr.bf16.mxu1 %v3826_v44 }
 0xca3   :  { %3482 = vmatpush3.bf16.msra.mxu1 %v3662_v10 }
 0xca4   :  { %3483 = vmatprep.subr.bf16.mxu1 %v3826_v44 }
 0xca7   :  { %3484 = vmatpush3.bf16.msra.mxu1 %v3663_v11 }
 0xca8   :  { %3485 = vmatprep.subr.bf16.mxu1 %v3826_v44 }
 0xcab   :  { %3486 = vmatpush3.bf16.msra.mxu1 %v3664_v21  ;;  %v3194_v21 = vld [vmem:[%s4644_s16 + $0xa] ss:$0 sm:$0xff] }
 0xcac   :  { %3487 = vmatprep.subr.bf16.mxu1 %v3826_v44 }
 0xcaf   :  { %3488 = vmatpush3.bf16.msra.mxu1 %v3665_v29 }
 0xcb0   :  { %3489 = vmatprep.subr.bf16.mxu1 %v3826_v44 }
 0xcb3   :  { %3490 = vmatpush3.bf16.msra.mxu1 %v3666_v12 }
 0xcb4   :  { %3491 = vmatprep.subr.bf16.mxu1 %v3826_v44 }
 0xcb7   :  { %3492 = vmatpush3.bf16.msra.mxu1 %v3667_v13 }
 0xcb8   :  { %3493 = vmatprep.subr.bf16.mxu1 %v3826_v44 }
 0xcbb   :  { %3494 = vmatpush3.bf16.msra.mxu1 %v3668_v19 }
 0xcbc   :  { %3529 = vmatprep.subr.bf16.mxu1 %v3826_v44 }
 0xcbe   :  { %3496 = vmatmul.mubr.msk.bf16.vlgmr.msra.gmra.mrb[52].mxu1 %vm3185_vm11, %v3835_v22 }
 0xcbf   :  { %3531 = vmatprep.mubr.msk.bf16.mxu1 %vm3827_vm3, %v3826_v44 }
 0xd71   :  { %v1536_v25 = vpop.f32.mrb[48].mxu1 }
 0xd72   :  { %v1543_v27 = vadd.f32 %v1536_v25, %v4197_v4  ;;  %v3469_v28 = vpop.f32.mrb[49].mxu1 }
 0xd73   :  { %v1539_v31 = vpop.f32.mrb[50].mxu1  ;;  %v3674_v28 = vld [vmem:[%s4643_s15 + $0x8] sm:$0xff]  }
 0xd74   :  { %v1544_v32 = vadd.f32 %v1539_v31, %v4200_v18  ;;  %v3470_v33 = vpop.f32.mrb[51].mxu1  ;;  %v1550_v34 = vadd.f32 %v3172_v30, %v1543_v27  ;;  %v3673_v27 = vld [vmem:[%s4643_s15] sm:$0xff]   ;;  %v3195_v31 = vld [vmem:[%s4644_s16 + $0xb] ss:$0 sm:$0xff]  ;;  %s3836_s15 = smov 96  }
 0xd76   :  { %v1551_v35 = vadd.f32 %v3172_v30, %v1544_v32 }
 0xd78   :  { %v1555_v36 = vpack.c.bf16 %v1551_v35, %v1550_v34 }
 0xd7a   :  { %3476 = vmatmul.mubr.msk.bf16.vlgmr.msra.gmra.mrb[32].mxu0 %vm216_vm1, %v1555_v36 }
 0xd7b   :  { %3500 = vmatpush3.bf16.msra.mxu0 %v3671_v60 }
 0xd7c   :  { %3501 = vmatprep.subr.bf16.mxu0 %v3672_v61 }
 0xd7f   :  { %3502 = vmatpush3.bf16.msra.mxu0 %v3672_v61 }
 0xd80   :  { %3507 = vmatprep.subr.bf16.mxu0 %v3673_v27 }
 0xd91   :  { %v1730_v37 = vpop.f32.mrb[52].mxu1 }
 0xd92   :  { %1739 = vst.msk [vmem:[#allocation2 + $0x8] sm:$0xff] %vm1737_vm12, %v1730_v37  ;;  %v3497_v38 = vpop.f32.mrb[53].mxu1 }
 0xd93   :  { %v1733_v18 = vpop.f32.mrb[54].mxu1 }
 0xd94   :  { %1741 = vst.msk [vmem:[#allocation2 + $0x18] sm:$0xff] %vm1737_vm12, %v1733_v18  ;;  %v3498_v41 = vpop.f32.mrb[55].mxu1  ;;  %v1925_v18 = vld [vmem:[%s4644_s16 + $0x28] sm:$0xff] }
 0xd95   :  { %v1924_v41 = vld [vmem:[%s4644_s16 + $0x20] sm:$0xff] }
 0xd99   :  { %v4305_v4 = vld [vmem:[#allocation2 + $0x8] sm:$0xff] }
 0xd9a   :  { %v1806_v39 = vmul.f32 %v4305_v4, %v4305_v4 }
 0xd9b   :  { %v4325_v55 = vld [vmem:[#allocation2 + $0x18] sm:$0xff] }
 0xd9c   :  { %v1812_v40 = vsel %vm1737_vm12, %v1806_v39, 0.0  ;;  %v1808_v57 = vmul.f32 %v4325_v55, %v4325_v55 }
 0xd9d   :  { %1813 = vadd.xlane.f32.xlu0 %v1812_v40 }
 0xd9e   :  { %v1818_v59 = vsel %vm1737_vm12, %v1808_v57, 0.0 }
 0xe2a   :  { %v1814_v63 = vpop.xlane.xlu0 %1813 }
 0xe2b   :  { %v1823_v58 = vmul.f32 0.03125, %v1814_v63 }
 0xe2d   :  { %v1827_v62 = vadd.f32 1e-06, %v1823_v58 }
 0xe2f   :  { %3729 = vrsqrt.f32 %v1827_v62 }
 0xe39   :  { %v3730_v9 = vpop.eup %3729 }
 0xe3a   :  { %v1835_v10 = vmul.f32 %v3730_v9, %v4305_v4 }
 0xe3c   :  { %v1843_v13 = vmul.f32 %v3194_v21, %v1835_v10 }
 0xe4d   :  { %v1610_v43 = vpop.f32.mrb[32].mxu0 }
 0xe4e   :  { %v1611_v45 = vadd.f32 %v3173_v42, %v1610_v43  ;;  %v3477_v46 = vpop.f32.mrb[33].mxu0  ;;  %v1926_v43 = vld [vmem:[%s4644_s16 + $0x30] sm:$0xff] }
 0xe4f   :  { %v1613_v47 = vpop.f32.mrb[34].mxu0 }
 0xe50   :  { %1738 = vst.msk [vmem:[#allocation2] sm:$0xff] %vm1737_vm12, %v1611_v45  ;;  %v1614_v48 = vadd.f32 %v3173_v42, %v1613_v47  ;;  %v3478_v49 = vpop.f32.mrb[35].mxu0  ;;  %v1927_v42 = vld [vmem:[%s4644_s16 + $0x38] sm:$0xff] }
 0xe52   :  { %1740 = vst.msk [vmem:[#allocation2 + $0x10] sm:$0xff] %vm1737_vm12, %v1614_v48 }
 0xe57   :  { %v4316_v50 = vld [vmem:[#allocation2] sm:$0xff] }
 0xe58   :  { %v1805_v51 = vmul.f32 %v4316_v50, %v4316_v50 }
 0xe59   :  { %v4320_v52 = vld [vmem:[#allocation2 + $0x10] sm:$0xff] }
 0xe5a   :  { %v1809_v53 = vsel %vm1737_vm12, %v1805_v51, 0.0  ;;  %v1807_v54 = vmul.f32 %v4320_v52, %v4320_v52 }
 0xe5b   :  { %1810 = vadd.xlane.f32.xlu1 %v1809_v53 }
 0xe5c   :  { %v1815_v56 = vsel %vm1737_vm12, %v1807_v54, 0.0 }
 0xe5f   :  { %1816 = vadd.xlane.f32.xlu1 %v1815_v56 }
 0xe63   :  { %1819 = vadd.xlane.f32.xlu1 %v1818_v59 }
 0xee8   :  { %v1811_v0 = vpop.xlane.xlu1 %1810 }
 0xee9   :  { %v1822_v2 = vmul.f32 0.03125, %v1811_v0 }
 0xeeb   :  { %v1826_v5 = vadd.f32 1e-06, %v1822_v2 }
 0xeec   :  { %v1817_v8 = vpop.xlane.xlu1 %1816 }
 0xeed   :  { %3731 = vrsqrt.f32 %v1826_v5  ;;  %v1824_v6 = vmul.f32 0.03125, %v1817_v8 }
 0xeef   :  { %v1828_v20 = vadd.f32 1e-06, %v1824_v6 }
 0xef0   :  { %v1820_v7 = vpop.xlane.xlu1 %1819 }
 0xef1   :  { %3733 = vrsqrt.f32 %v1828_v20  ;;  %v1825_v16 = vmul.f32 0.03125, %v1820_v7 }
 0xef3   :  { %v1829_v26 = vadd.f32 1e-06, %v1825_v16 }
 0xef5   :  { %3735 = vrsqrt.f32 %v1829_v26 }
 0xef7   :  { %v3732_v11 = vpop.eup %3731 }
 0xef8   :  { %v1834_v29 = vmul.f32 %v3732_v11, %v4316_v50 }
 0xefa   :  { %v1842_v12 = vmul.f32 %v3194_v21, %v1834_v29 }
 0xefb   :  { %v3734_v15 = vpop.eup %3733 }
 0xefc   :  { %v1850_v17 = vpack.c.bf16 %v1843_v13, %v1842_v12  ;;  %v1836_v19 = vmul.f32 %v3734_v15, %v4320_v52 }
 0xefe   :  { %3503 = vmatprep.mubr.msk.bf16.mxu0 %vm1737_vm12, %v1850_v17  ;;  %v1844_v23 = vmul.f32 %v3194_v21, %v1836_v19 }
 0xeff   :  { %v3736_v22 = vpop.eup %3735 }
 0xf00   :  { %v1837_v1 = vmul.f32 %v3736_v22, %v4325_v55 }
 0xf02   :  { %v1845_v24 = vmul.f32 %v3194_v21, %v1837_v1 }
 0xf04   :  { %v1851_v25 = vpack.c.bf16 %v1845_v24, %v1844_v23 }
 0xf06   :  { %3504 = vmatmul.mubr.msk.bf16.vlgmr.msra.gmra.mrb[36].mxu0 %vm1737_vm12, %v1851_v25 }
 0xf07   :  { %3508 = vmatpush3.bf16.msra.mxu0 %v3673_v27 }
 0xf08   :  { %3509 = vmatprep.subr.bf16.mxu0 %v3674_v28 }
 0xf0b   :  { %3510 = vmatpush3.bf16.msra.mxu0 %v3674_v28 }
 0xf0c   :  { %3515 = vmatprep.subr.bf16.mxu0 %v3673_v27 }
 0xfd9   :  { %v3505_v30 = vpop.f32.mrb[36].mxu0 }
 0xfda   :  { %v1909_v32 = vpop.f32.mrb[37].mxu0  ;;  %v4355_v34 = vadd.f32 %v3505_v30, %v3195_v31 }
 0xfdb   :  { %v3506_v33 = vpop.f32.mrb[38].mxu0  ;;  %v4359_v37 = vadd.f32 %v3195_v31, %v1909_v32 }
 0xfdc   :  { %v4357_v35 = vadd.f32 %v3506_v33, %v3195_v31  ;;  %v1912_v36 = vpop.f32.mrb[39].mxu0  ;;  %v1930_v53 = vmul.f32 %v1926_v43, %v4355_v34 }
 0xfdd   :  { %v4361_v38 = vadd.f32 %v3195_v31, %v1912_v36  ;;  %v1928_v57 = vmul.f32 %v1924_v41, %v4359_v37 }
 0xfde   :  { %v4365_v39 = vpack.c.bf16 %v4357_v35, %v4355_v34  ;;  %v1931_v63 = vmul.f32 %v1927_v42, %v4357_v35 }
 0xfdf   :  { %v4369_v40 = vpack.c.bf16 %v4361_v38, %v4359_v37  ;;  %v1929_v2 = vmul.f32 %v1925_v18, %v4361_v38 }
 0xfe0   :  { %2049 = vrot.lane.b32.xlu0 %v4365_v39, %s3836_s15 }
 0xfe1   :  { %2047 = vrot.lane.b32.xlu1 %v4369_v40, %s3836_s15  ;;  %3511 = vmatprep.mubr.msk.bf16.mxu0 %vm1737_vm12, %v4369_v40 }
 0xfe2   :  { %3512 = vmatmul.mubr.msk.bf16.vlgmr.msra.gmra.mrb[40].mxu0 %vm1737_vm12, %v4365_v39 }
 0xfe3   :  { %3516 = vmatpush3.bf16.msra.mxu0 %v3673_v27 }
 0xfe4   :  { %2031 = vrot.lane.b32.xlu0 %v1925_v18, %s3837_s4  ;;  %3517 = vmatprep.subr.bf16.mxu0 %v3674_v28 }
 0xfe5   :  { %2009 = vrot.lane.b32.xlu1 %v1924_v41, %s3836_s15 }
 0xfe7   :  { %3518 = vmatpush3.bf16.msra.mxu0 %v3674_v28 }
 0xfe8   :  { %2035 = vrot.lane.b32.xlu0 %v1927_v42, %s3837_s4  ;;  %3523 = vmatprep.subr.bf16.mxu0 %v3826_v44 }
 0xfe9   :  { %2011 = vrot.lane.b32.xlu1 %v1925_v18, %s3836_s15 }
 0xfed   :  { %2013 = vrot.lane.b32.xlu1 %v1926_v43, %s3836_s15 }
 0xff1   :  { %2015 = vrot.lane.b32.xlu1 %v1927_v42, %s3836_s15 }
 0xff5   :  { %2029 = vrot.lane.b32.xlu1 %v1924_v41, %s3837_s4 }
 0xff9   :  { %2033 = vrot.lane.b32.xlu1 %v1926_v43, %s3837_s4  ;;  %v3838_v43 = vmov 1966171168  }
0x1052   :  { %v2050_v46 = vpop.permute.xlu0 %2049 }
0x1053   :  { %v2048_v45 = vpop.permute.xlu1 %2047 }
0x1054   :  { %3519 = vmatprep.mubr.msk.bf16.mxu0 %vm1737_vm12, %v2048_v45  ;;  %v1761_v45 = vunpack.c.l.s4 %v3838_v43 }
0x1055   :  { %3520 = vmatmul.mubr.msk.bf16.vlgmr.msra.gmra.mrb[44].mxu0 %vm1737_vm12, %v2050_v46  ;;  %v1755_v46 = vld [vmem:[%s4630_s2] sm:$0x3]  ;;  %s3839_s2 = smov 64  }
0x1056   :  { %3525 = vmatprep.mubr.msk.bf16.mxu0 %vm3827_vm3, %v3826_v44  ;;  %v2032_v17 = vpop.permute.xlu0 %2031  ;;  %vm1756_vm14 = vcmp.gt.s32.totalorder %v1755_v46, 0 }
0x1057   :  { %v2010_v47 = vpop.permute.xlu1 %2009  ;;  %v2042_v23 = vmul.f32 %v2032_v17, %v4361_v38 }
0x105a   :  { %v2036_v22 = vpop.permute.xlu0 %2035 }
0x105b   :  { %v2012_v48 = vpop.permute.xlu1 %2011  ;;  %v2044_v31 = vmul.f32 %v2036_v22, %v4357_v35 }
0x105f   :  { %v2014_v49 = vpop.permute.xlu1 %2013 }
0x1063   :  { %v2016_v59 = vpop.permute.xlu1 %2015 }
0x1067   :  { %v2030_v15 = vpop.permute.xlu1 %2029 }
0x1068   :  { %v2041_v24 = vmul.f32 %v2030_v15, %v4359_v37 }
0x106b   :  { %v2034_v19 = vpop.permute.xlu1 %2033 }
0x106c   :  { %v2043_v32 = vmul.f32 %v2034_v19, %v4355_v34 }
0x10b5   :  { %v3513_v51 = vpop.f32.mrb[40].mxu0 }
0x10b6   :  { %v2023_v54 = vmul.f32 %v3513_v51, %v2014_v49  ;;  %v1990_v56 = vpop.f32.mrb[41].mxu0 }
0x10b7   :  { %v2021_v60 = vmul.f32 %v2010_v47, %v1990_v56  ;;  %v3514_v61 = vpop.f32.mrb[42].mxu0  ;;  %v1748_v56 = vadd.s32 8, %v4031_v3 }
0x10b8   :  { %v2027_v58 = vadd.f32 %v2023_v54, %v1930_v53  ;;  %v2024_v62 = vmul.f32 %v3514_v61, %v2016_v59  ;;  %v1993_v0 = vpop.f32.mrb[43].mxu0  ;;  %v1784_v54 = vsub.s32 0, %v4031_v3  ;;  %v3187_v61 = vsel %vm1749_vm15, 1.0, %v3826_v44 }
0x10b9   :  { %v2025_v5 = vadd.f32 %v2021_v60, %v1928_v57  ;;  %v2022_v8 = vmul.f32 %v2012_v48, %v1993_v0  ;;  %vm1750_vm1 = vcmp.le.s32.totalorder %v4279_v14, %v1748_v56 }
0x10ba   :  { %v2028_v6 = vadd.f32 %v2024_v62, %v1931_v63  ;;  %v3188_v63 = vsel %vm1750_vm1, 1.0, %v3826_v44 }
0x10bb   :  { %v2026_v20 = vadd.f32 %v2022_v8, %v1929_v2 }
0x10bc   :  { %v4408_v7 = vpack.c.bf16 %v2028_v6, %v2027_v58 }
0x10bd   :  { %v4410_v16 = vpack.c.bf16 %v2026_v20, %v2025_v5 }
0x1128   :  { %v3521_v9 = vpop.f32.mrb[44].mxu0 }
0x1129   :  { %v2091_v26 = vpop.f32.mrb[45].mxu0  ;;  %v2108_v12 = vmul.f32 %v3521_v9, %v2014_v49  ;;  %v3189_v49 = vsel %vm1756_vm14, 1.0, %v3826_v44 }
0x112a   :  { %v2106_v10 = vmul.f32 %v2091_v26, %v2010_v47  ;;  %v3522_v11 = vpop.f32.mrb[46].mxu0  ;;  %v1762_v47 = vunpack.c.0.s8 %v1761_v45 }
0x112b   :  { %v2094_v21 = vpop.f32.mrb[47].mxu0  ;;  %v2109_v13 = vmul.f32 %v3522_v11, %v2016_v59 }
0x112c   :  { %v2107_v29 = vmul.f32 %v2094_v21, %v2012_v48  ;;  %2114 = vrot.lane.b32.xlu1 %v2106_v10, %s3837_s4  ;;  %v1765_v48 = vsub.s32 %v1762_v47, %v4031_v3 }
0x112e   :  { %2116 = vrot.lane.b32.xlu0 %v2107_v29, %s3837_s4  ;;  %v1766_v51 = vrot.slane %v3189_v49, %v1765_v48 }
0x1130   :  { %2118 = vrot.lane.b32.xlu1 %v2108_v12, %s3837_s4  ;;  %v1774_v53 = vrot.slane %v1766_v51, %v1765_v48  ;;  %v1767_v57 = vcombine.high %v1766_v51, %v1766_v51 }
0x1132   :  { %2120 = vrot.lane.b32.xlu0 %v2109_v13, %s3837_s4  ;;  %v1785_v59 = vrot.slane %v1774_v53, %v1784_v54  ;;  %v1781_v60 = vrot.slane %v1767_v57, %v1765_v48 }
0x1134   :  { %v1792_v58 = vmul.f32 %v3187_v61, %v1785_v59  ;;  %v1789_v62 = vrot.slane %v1781_v60, %v1784_v54  ;;  %v1793_v0 = vmul.f32 %v3188_v63, %v1785_v59 }
0x1136   :  { %v3190_v2 = vadd.f32 -1.0, %v1792_v58  ;;  %v1794_v5 = vmul.f32 %v3187_v61, %v1789_v62  ;;  %v3191_v8 = vadd.f32 -1.0, %v1793_v0  ;;  %v1795_v6 = vmul.f32 %v3188_v63, %v1789_v62 }
0x1138   :  { %v4452_v20 = vmul.f32 1e+09, %v3190_v2  ;;  %v3192_v9 = vadd.f32 -1.0, %v1794_v5  ;;  %v4454_v11 = vmul.f32 1e+09, %v3191_v8  ;;  %v3193_v14 = vadd.f32 -1.0, %v1795_v6 }
0x113a   :  { %v4457_v15 = vmul.f32 1e+09, %v3192_v9 }
0x119e   :  { %v2115_v1 = vpop.permute.xlu1 %2114 }
0x119f   :  { %v2126_v27 = vadd.f32 %v2115_v1, %v2041_v24  ;;  %v4461_v24 = vmul.f32 1e+09, %v3193_v14 }
0x11a0   :  { %v2117_v25 = vpop.permute.xlu0 %2116 }
0x11a1   :  { %v2127_v28 = vadd.f32 %v2117_v25, %v2042_v23 }
0x11a2   :  { %v2119_v30 = vpop.permute.xlu1 %2118 }
0x11a3   :  { %v4420_v33 = vpack.c.bf16 %v2127_v28, %v2126_v27  ;;  %v2128_v18 = vadd.f32 %v2119_v30, %v2043_v32 }
0x11a4   :  { %v2121_v36 = vpop.permute.xlu0 %2120 }
0x11a5   :  { %v2129_v41 = vadd.f32 %v2121_v36, %v2044_v31  ;;  %2135 = vrot.lane.b32.xlu1 %v4420_v33, %s3836_s15 }
0x11a7   :  { %v4424_v42 = vpack.c.bf16 %v2129_v41, %v2128_v18 }
0x11a9   :  { %2186 = vrot.lane.b32.xlu0 %v4424_v42, %s3836_s15 }
0x1217   :  { %v2136_v37 = vpop.permute.xlu1 %2135 }
0x1218   :  { %v2142_v38 = vsel %vm2137_vm13, %v2136_v37, 0 }
0x1219   :  { %3524 = vmatpush3.bf16.xpose.msra.mxu0 %v2142_v38 }
0x121a   :  { %3535 = vmatprep.subr.bf16.mxu0 %v3826_v44 }
0x121b   :  { %v2187_v34 = vpop.permute.xlu0 %2186 }
0x121c   :  { %v2192_v35 = vsel %vm2137_vm13, %v2187_v34, 0 }
0x121d   :  { %3530 = vmatpush3.bf16.xpose.msra.mxu1 %v2192_v35 }
0x121e   :  { %3541 = vmatprep.subr.bf16.mxu1 %v3826_v44 }
0x1220   :  { %3526 = vmatmul.mubr.msk.bf16.vlgmr.msra.gmra.mrb[48].mxu0 %vm2137_vm13, %v4410_v16 }
0x1221   :  { %3537 = vmatprep.mubr.msk.bf16.mxu0 %vm3827_vm3, %v3826_v44 }
0x1224   :  { %3532 = vmatmul.mubr.msk.bf16.vlgmr.msra.gmra.mrb[56].mxu1 %vm2137_vm13, %v4408_v7 }
0x1225   :  { %3543 = vmatprep.mubr.msk.bf16.mxu1 %vm3827_vm3, %v3826_v44 }
0x12f3   :  { %v2178_v26 = vpop.f32.mrb[48].mxu0 }
0x12f4   :  { %v2235_v3 = vmul.f32 0.25, %v2178_v26  ;;  %v3527_v10 = vpop.f32.mrb[49].mxu0 }
0x12f5   :  { %v2181_v21 = vpop.f32.mrb[50].mxu0 }
0x12f6   :  { %v2236_v29 = vmul.f32 0.25, %v2181_v21  ;;  %v3528_v12 = vpop.f32.mrb[51].mxu0  ;;  %v2239_v13 = vadd.f32 %v2235_v3, %v4452_v20 }
0x12f7   :  { %v2228_v17 = vpop.f32.mrb[56].mxu1 }
0x12f8   :  { %v2237_v19 = vmul.f32 0.25, %v2228_v17  ;;  %v3533_v22 = vpop.f32.mrb[57].mxu1  ;;  %v2243_v1 = vsel %vm2137_vm13, %v2239_v13, -inf  ;;  %v2240_v23 = vadd.f32 %v2236_v29, %v4454_v11 }
0x12f9   :  { %2244 = vmax.xlane.f32.xlu1 %v2243_v1  ;;  %v2231_v25 = vpop.f32.mrb[58].mxu1 }
0x12fa   :  { %v2238_v27 = vmul.f32 0.25, %v2231_v25  ;;  %v3534_v28 = vpop.f32.mrb[59].mxu1  ;;  %v2246_v30 = vsel %vm2137_vm13, %v2240_v23, -inf  ;;  %v2241_v31 = vadd.f32 %v2237_v19, %v4457_v15 }
0x12fb   :  { %2247 = vmax.xlane.f32.xlu0 %v2246_v30 }
0x12fc   :  { %v2242_v32 = vadd.f32 %v2238_v27, %v4461_v24  ;;  %v2249_v36 = vsel %vm2137_vm13, %v2241_v31, -inf }
0x12fe   :  { %v2252_v18 = vsel %vm2137_vm13, %v2242_v32, -inf }
0x12ff   :  { %2250 = vmax.xlane.f32.xlu0 %v2249_v36  ;;  %2253 = vmax.xlane.f32.xlu1 %v2252_v18 }
0x1310   :  { %2336 = vrot.lane.b32.xlu1 %v4365_v39, %s3839_s2 }
0x1315   :  { %2289 = vrot.lane.b32.xlu0 %v4369_v40, %s3839_s2 }
0x1386   :  { %v2245_v41 = vpop.xlane.xlu1 %2244 }
0x1387   :  { %v2255_v38 = vsub.f32 %v2239_v13, %v2245_v41 }
0x1388   :  { %v2248_v37 = vpop.xlane.xlu0 %2247 }
0x1389   :  { %v2256_v34 = vsub.f32 %v2240_v23, %v2248_v37  ;;  %v2259_v47 = vmul.f32 1.442695, %v2255_v38 }
0x138b   :  { %v2261_v51 = vmul.f32 1.442695, %v2256_v34 }
0x138c   :  { %v2251_v35 = vpop.xlane.xlu0 %2250  ;;  %v2254_v43 = vpop.xlane.xlu1 %2253 }
0x138d   :  { %v2257_v45 = vsub.f32 %v2241_v31, %v2251_v35  ;;  %v2258_v46 = vsub.f32 %v2242_v32, %v2254_v43 }
0x138f   :  { %v2263_v48 = vmul.f32 1.442695, %v2257_v45  ;;  %v2265_v49 = vmul.f32 1.442695, %v2258_v46 }
0x1390   :  { %v2290_v53 = vpop.permute.xlu0 %2289  ;;  %v2337_v54 = vpop.permute.xlu1 %2336 }
0x1391   :  { %3737 = vpow2.f32 %v2263_v48  ;;  %3536 = vmatpush3.bf16.msra.mxu0 %v2290_v53  ;;  %3542 = vmatpush3.bf16.msra.mxu1 %v2337_v54 }
0x1392   :  { %3739 = vpow2.f32 %v2265_v49  ;;  %3553 = vmatprep.subr.bf16.mxu1 %v3826_v44  ;;  %3547 = vmatprep.subr.bf16.mxu0 %v3826_v44 }
0x1393   :  { %3741 = vpow2.f32 %v2259_v47 }
0x1394   :  { %3743 = vpow2.f32 %v2261_v51 }
0x139b   :  { %v3738_v56 = vpop.eup %3737 }
0x139c   :  { %v3740_v57 = vpop.eup %3739  ;;  %v2273_v59 = vsel %vm2137_vm13, %v3738_v56, 0.0 }
0x139d   :  { %v3742_v60 = vpop.eup %3741  ;;  %2274 = vadd.xlane.f32.xlu0 %v2273_v59  ;;  %v2276_v61 = vsel %vm2137_vm13, %v3740_v57, 0.0 }
0x139e   :  { %v3744_v63 = vpop.eup %3743  ;;  %2277 = vadd.xlane.f32.xlu1 %v2276_v61  ;;  %v2267_v58 = vsel %vm2137_vm13, %v3742_v60, 0.0 }
0x139f   :  { %v2270_v62 = vsel %vm2137_vm13, %v3744_v63, 0.0 }
0x13a1   :  { %2268 = vadd.xlane.f32.xlu0 %v2267_v58 }
0x13a2   :  { %2271 = vadd.xlane.f32.xlu1 %v2270_v62 }
0x13b3   :  { %2386 = vrot.lane.b32.xlu1 %v4420_v33, %s3830_s28 }
0x13b7   :  { %2384 = vrot.lane.b32.xlu1 %v4410_v16, %s3840_s27  ;;  %2438 = vrot.lane.b32.xlu0 %v4424_v42, %s3830_s28  ;;  %s3841_s28 = smov 48  }
0x13bb   :  { %2436 = vrot.lane.b32.xlu0 %v4408_v7, %s3840_s27 }
0x142a   :  { %v2275_v0 = vpop.xlane.xlu0 %2274 }
0x142b   :  { %3745 = vrcp.f32 %v2275_v0  ;;  %v2278_v2 = vpop.xlane.xlu1 %2277 }
0x142c   :  { %3747 = vrcp.f32 %v2278_v2 }
0x142e   :  { %v2269_v5 = vpop.xlane.xlu0 %2268 }
0x142f   :  { %3749 = vrcp.f32 %v2269_v5  ;;  %v2272_v8 = vpop.xlane.xlu1 %2271 }
0x1430   :  { %3751 = vrcp.f32 %v2272_v8 }
0x1432   :  { %v2439_v3 = vpop.permute.xlu0 %2438 }
0x1433   :  { %v2444_v7 = vsel %vm2137_vm13, %v2439_v3, 0  ;;  %v2387_v29 = vpop.permute.xlu1 %2386 }
0x1434   :  { %v2392_v13 = vsel %vm2137_vm13, %v2387_v29, 0 }
0x1435   :  { %v3746_v6 = vpop.eup %3745 }
0x1436   :  { %v3748_v9 = vpop.eup %3747  ;;  %v2285_v26 = vmul.f32 %v3746_v6, %v3738_v56  ;;  %v2437_v17 = vpop.permute.xlu0 %2436 }
0x1437   :  { %v2286_v33 = vmul.f32 %v3748_v9, %v3740_v57  ;;  %v2385_v19 = vpop.permute.xlu1 %2384 }
0x1439   :  { %v3750_v10 = vpop.eup %3749  ;;  %v2288_v16 = vpack.c.bf16 %v2286_v33, %v2285_v26 }
0x143a   :  { %v3752_v14 = vpop.eup %3751  ;;  %v2283_v21 = vmul.f32 %v3750_v10, %v3742_v60 }
0x143b   :  { %v2284_v42 = vmul.f32 %v3752_v14, %v3744_v63  ;;  %3544 = vmatmul.mubr.msk.bf16.vlgmr.msra.gmra.mrb[60].mxu1 %vm2137_vm13, %v2288_v16 }
0x143c   :  { %3554 = vmatpush3.bf16.xpose.msra.mxu1 %v2444_v7  ;;  %3555 = vmatprep.mubr.msk.bf16.mxu1 %vm3827_vm3, %v3826_v44 }
0x143d   :  { %v2287_v12 = vpack.c.bf16 %v2284_v42, %v2283_v21  ;;  %3565 = vmatprep.subr.bf16.mxu1 %v3826_v44 }
0x143f   :  { %3538 = vmatmul.mubr.msk.bf16.vlgmr.msra.gmra.mrb[52].mxu0 %vm2137_vm13, %v2287_v12 }
0x1440   :  { %3548 = vmatpush3.bf16.xpose.msra.mxu0 %v2392_v13  ;;  %3549 = vmatprep.mubr.msk.bf16.mxu0 %vm3827_vm3, %v3826_v44 }
0x1441   :  { %3559 = vmatprep.subr.bf16.mxu0 %v3826_v44 }
0x1443   :  { %3556 = vmatmul.mubr.msk.bf16.vlgmr.msra.gmra.mrb[64].mxu1 %vm2137_vm13, %v2437_v17 }
0x1444   :  { %3567 = vmatprep.mubr.msk.bf16.mxu1 %vm3827_vm3, %v3826_v44 }
0x1447   :  { %3550 = vmatmul.mubr.msk.bf16.vlgmr.msra.gmra.mrb[56].mxu0 %vm2137_vm13, %v2385_v19 }
0x1448   :  { %3561 = vmatprep.mubr.msk.bf16.mxu0 %vm3827_vm3, %v3826_v44 }
0x150e   :  { %v4500_v22 = vpop.f32.mrb[60].mxu1 }
0x150f   :  { %v3545_v1 = vpop.f32.mrb[61].mxu1 }
0x1510   :  { %v4502_v23 = vpop.f32.mrb[62].mxu1 }
0x1511   :  { %v3546_v25 = vpop.f32.mrb[63].mxu1 }
0x1512   :  { %v4504_v27 = vpop.f32.mrb[52].mxu0 }
0x1513   :  { %v3539_v28 = vpop.f32.mrb[53].mxu0 }
0x1514   :  { %v4506_v30 = vpop.f32.mrb[54].mxu0 }
0x1515   :  { %v3540_v31 = vpop.f32.mrb[55].mxu0 }
0x1516   :  { %v2480_v32 = vpop.f32.mrb[64].mxu1 }
0x1517   :  { %v3557_v36 = vpop.f32.mrb[65].mxu1  ;;  %v2489_v43 = vmul.f32 0.25, %v2480_v32  ;;  %v3675_v32 = vld [vmem:[%s4639_s11] sm:$0xff]  }
0x1518   :  { %v2483_v18 = vpop.f32.mrb[66].mxu1  ;;  %v3676_v36 = vld [vmem:[%s4639_s11 + $0x8] sm:$0xff]  }
0x1519   :  { %v3558_v41 = vpop.f32.mrb[67].mxu1  ;;  %v2490_v38 = vmul.f32 0.25, %v2483_v18  ;;  %v2493_v54 = vadd.f32 %v2489_v43, %v4457_v15 }
0x151a   :  { %v2428_v37 = vpop.f32.mrb[56].mxu0 }
0x151b   :  { %v2487_v34 = vmul.f32 0.25, %v2428_v37  ;;  %v3551_v44 = vpop.f32.mrb[57].mxu0  ;;  %v2494_v51 = vadd.f32 %v2490_v38, %v4461_v24  ;;  %v2501_v57 = vsel %vm2137_vm13, %v2493_v54, -inf }
0x151c   :  { %v2431_v35 = vpop.f32.mrb[58].mxu0 }
0x151d   :  { %v2488_v45 = vmul.f32 0.25, %v2431_v35  ;;  %v3552_v46 = vpop.f32.mrb[59].mxu0  ;;  %v2491_v47 = vadd.f32 %v2487_v34, %v4452_v20  ;;  %v2504_v56 = vsel %vm2137_vm13, %v2494_v51, -inf }
0x151f   :  { %v2495_v48 = vsel %vm2137_vm13, %v2491_v47, -inf  ;;  %v2492_v49 = vadd.f32 %v2488_v45, %v4454_v11 }
0x1520   :  { %2496 = vmax.xlane.f32.xlu1 %v2495_v48 }
0x1521   :  { %v2498_v53 = vsel %vm2137_vm13, %v2492_v49, -inf }
0x1522   :  { %2499 = vmax.xlane.f32.xlu0 %v2498_v53 }
0x1524   :  { %2505 = vmax.xlane.f32.xlu1 %v2504_v56 }
0x1526   :  { %2502 = vmax.xlane.f32.xlu0 %v2501_v57 }
0x15ad   :  { %v2497_v59 = vpop.xlane.xlu1 %2496 }
0x15ae   :  { %v2507_v63 = vsub.f32 %v2491_v47, %v2497_v59 }
0x15af   :  { %v2500_v20 = vpop.xlane.xlu0 %2499 }
0x15b0   :  { %v2508_v60 = vsub.f32 %v2492_v49, %v2500_v20  ;;  %v2511_v2 = vmul.f32 1.442695, %v2507_v63 }
0x15b1   :  { %v2506_v61 = vpop.xlane.xlu1 %2505 }
0x15b2   :  { %v2510_v11 = vsub.f32 %v2494_v51, %v2506_v61  ;;  %v2513_v58 = vmul.f32 1.442695, %v2508_v60 }
0x15b3   :  { %v2503_v24 = vpop.xlane.xlu0 %2502 }
0x15b4   :  { %v2517_v62 = vmul.f32 1.442695, %v2510_v11  ;;  %v2509_v0 = vsub.f32 %v2493_v54, %v2503_v24 }
0x15b6   :  { %3753 = vpow2.f32 %v2517_v62  ;;  %v2515_v15 = vmul.f32 1.442695, %v2509_v0 }
0x15b7   :  { %3755 = vpow2.f32 %v2513_v58 }
0x15b8   :  { %3757 = vpow2.f32 %v2515_v15 }
0x15b9   :  { %3759 = vpow2.f32 %v2511_v2 }
0x15c0   :  { %v3754_v5 = vpop.eup %3753 }
0x15c1   :  { %v3756_v8 = vpop.eup %3755  ;;  %v2528_v6 = vsel %vm2137_vm13, %v3754_v5, 0.0 }
0x15c2   :  { %v3758_v9 = vpop.eup %3757  ;;  %2529 = vadd.xlane.f32.xlu1 %v2528_v6  ;;  %v2522_v3 = vsel %vm2137_vm13, %v3756_v8, 0.0 }
0x15c3   :  { %v2525_v26 = vsel %vm2137_vm13, %v3758_v9, 0.0  ;;  %v3760_v33 = vpop.eup %3759 }
0x15c4   :  { %2526 = vadd.xlane.f32.xlu0 %v2525_v26  ;;  %v2519_v10 = vsel %vm2137_vm13, %v3760_v33, 0.0 }
0x15c6   :  { %2523 = vadd.xlane.f32.xlu1 %v2522_v3 }
0x15c8   :  { %2520 = vadd.xlane.f32.xlu0 %v2519_v10 }
0x15d7   :  { %2588 = vrot.lane.b32.xlu1 %v4365_v39, %s3841_s28 }
0x15de   :  { %2541 = vrot.lane.b32.xlu0 %v4369_v40, %s3841_s28 }
0x164f   :  { %v2530_v16 = vpop.xlane.xlu1 %2529 }
0x1650   :  { %3761 = vrcp.f32 %v2530_v16 }
0x1651   :  { %v2527_v14 = vpop.xlane.xlu0 %2526 }
0x1652   :  { %3763 = vrcp.f32 %v2527_v14 }
0x1653   :  { %v2524_v21 = vpop.xlane.xlu1 %2523 }
0x1654   :  { %3765 = vrcp.f32 %v2524_v21 }
0x1655   :  { %v2521_v42 = vpop.xlane.xlu0 %2520 }
0x1656   :  { %3767 = vrcp.f32 %v2521_v42 }
0x1657   :  { %v2589_v7 = vpop.permute.xlu1 %2588 }
0x1658   :  { %3566 = vmatpush3.bf16.msra.mxu1 %v2589_v7 }
0x1659   :  { %v2542_v29 = vpop.permute.xlu0 %2541 }
0x165a   :  { %v3762_v12 = vpop.eup %3761  ;;  %3560 = vmatpush3.bf16.msra.mxu0 %v2542_v29 }
0x165b   :  { %v2538_v17 = vmul.f32 %v3762_v12, %v3754_v5  ;;  %3571 = vmatprep.subr.bf16.mxu0 %v3675_v32  ;;  %v3677_v5 = vld [vmem:[%s4640_s12] sm:$0xff]  }
0x165c   :  { %v3764_v13 = vpop.eup %3763  ;;  %3579 = vmatprep.subr.bf16.mxu1 %v3677_v5 }
0x165d   :  { %v2537_v19 = vmul.f32 %v3764_v13, %v3758_v9 }
0x165e   :  { %v3766_v1 = vpop.eup %3765 }
0x165f   :  { %v2540_v39 = vpack.c.bf16 %v2538_v17, %v2537_v19  ;;  %v2536_v40 = vmul.f32 %v3766_v1, %v3756_v8  ;;  %v3678_v8 = vld [vmem:[%s4640_s12 + $0x8] sm:$0xff]  }
0x1660   :  { %v3768_v25 = vpop.eup %3767  ;;  %v3218_v19 = vld [vmem:[%s4644_s16 + $0xc] ss:$0 sm:$0xff] }
0x1661   :  { %v2535_v28 = vmul.f32 %v3768_v25, %v3760_v33  ;;  %3568 = vmatmul.mubr.msk.bf16.vlgmr.msra.gmra.mrb[68].mxu1 %vm2137_vm13, %v2540_v39 }
0x1662   :  { %3580 = vmatpush3.bf16.msra.mxu1 %v3677_v5 }
0x1663   :  { %v2539_v31 = vpack.c.bf16 %v2536_v40, %v2535_v28  ;;  %3581 = vmatprep.subr.bf16.mxu1 %v3678_v8 }
0x1665   :  { %3562 = vmatmul.mubr.msk.bf16.vlgmr.msra.gmra.mrb[60].mxu0 %vm2137_vm13, %v2539_v31 }
0x1666   :  { %3572 = vmatpush3.bf16.msra.mxu0 %v3675_v32  ;;  %3582 = vmatpush3.bf16.msra.mxu1 %v3678_v8 }
0x1667   :  { %3573 = vmatprep.subr.bf16.mxu0 %v3676_v36 }
0x166a   :  { %3574 = vmatpush3.bf16.msra.mxu0 %v3676_v36 }
0x1734   :  { %v2628_v18 = vpop.f32.mrb[68].mxu1 }
0x1735   :  { %v3569_v41 = vpop.f32.mrb[69].mxu1 }
0x1736   :  { %v2631_v37 = vpop.f32.mrb[70].mxu1 }
0x1737   :  { %v3635_v38 = vpack.i.bf16 %v2631_v37, %v2628_v18  ;;  %v3570_v34 = vpop.f32.mrb[71].mxu1 }
0x1738   :  { %v2581_v44 = vpop.f32.mrb[60].mxu0  ;;  %v3680_v34 = vld [vmem:[%s4641_s13 + $0x8] sm:$0xff]  }
0x1739   :  { %v3563_v35 = vpop.f32.mrb[61].mxu0  ;;  %3636 = vrot.lane.b32.xlu0 %v3635_v38, %s3842_s30  ;;  %v3679_v38 = vld [vmem:[%s4641_s13] sm:$0xff]  }
0x173a   :  { %v2584_v43 = vpop.f32.mrb[62].mxu0  ;;  %3587 = vmatprep.subr.bf16.mxu0 %v3679_v38  ;;  %v3682_v35 = vld [vmem:[%s4641_s13 + $0x18] sm:$0xff]  }
0x173b   :  { %v3630_v45 = vpack.i.bf16 %v2584_v43, %v2581_v44  ;;  %v3564_v46 = vpop.f32.mrb[63].mxu0  ;;  %v3681_v44 = vld [vmem:[%s4641_s13 + $0x10] sm:$0xff]  }
0x173d   :  { %3631 = vrot.lane.b32.xlu1 %v3630_v45, %s3842_s30 }
0x17ab   :  { %v3637_v47 = vpop.permute.xlu0 %3636 }
0x17ac   :  { %v3639_v48 = vunpack.i.h.bf16 %v3637_v47  ;;  %v3638_v49 = vunpack.i.l.bf16 %v3637_v47 }
0x17ae   :  { %v2654_v51 = vsel %vm2137_vm13, %v4502_v23, %v3639_v48  ;;  %v2653_v53 = vsel %vm2137_vm13, %v4500_v22, %v3638_v49 }
0x17af   :  { %v2660_v54 = vpack.c.bf16 %v2654_v51, %v2653_v53  ;;  %v3632_v56 = vpop.permute.xlu1 %3631 }
0x17b0   :  { %v3634_v57 = vunpack.i.h.bf16 %v3632_v56  ;;  %v3633_v59 = vunpack.i.l.bf16 %v3632_v56 }
0x17b2   :  { %v2652_v20 = vsel %vm2137_vm13, %v4506_v30, %v3634_v57  ;;  %v2651_v60 = vsel %vm2137_vm13, %v4504_v27, %v3633_v59 }
0x17b3   :  { %v2659_v61 = vpack.c.bf16 %v2652_v20, %v2651_v60 }
0x17b5   :  { %3575 = vmatprep.mubr.msk.bf16.mxu0 %vm1737_vm12, %v2659_v61 }
0x17b6   :  { %3576 = vmatmul.mubr.msk.bf16.vlgmr.msra.gmra.mrb[64].mxu0 %vm1737_vm12, %v2660_v54 }
0x17b7   :  { %3588 = vmatpush3.bf16.msra.mxu0 %v3679_v38 }
0x17b8   :  { %3589 = vmatprep.subr.bf16.mxu0 %v3680_v34 }
0x17bb   :  { %3590 = vmatpush3.bf16.msra.mxu0 %v3680_v34 }
0x17bc   :  { %3591 = vmatprep.subr.bf16.mxu0 %v3681_v44 }
0x17bf   :  { %3592 = vmatpush3.bf16.msra.mxu0 %v3681_v44 }
0x17c0   :  { %3593 = vmatprep.subr.bf16.mxu0 %v3682_v35 }
0x17c3   :  { %3594 = vmatpush3.bf16.msra.mxu0 %v3682_v35 }
0x1889   :  { %v3577_v63 = vpop.f32.mrb[64].mxu0 }
0x188a   :  { %v2713_v23 = vpop.f32.mrb[65].mxu0  ;;  %v4547_v30 = vadd.f32 %v3577_v63, %v4320_v52 }
0x188b   :  { %v4541_v11 = vadd.f32 %v2713_v23, %v4316_v50  ;;  %v3578_v22 = vpop.f32.mrb[66].mxu0 }
0x188c   :  { %v4544_v58 = vadd.f32 %v3578_v22, %v4325_v55  ;;  %v2716_v24 = vpop.f32.mrb[67].mxu0  ;;  %v2735_v52 = vmul.f32 %v4547_v30, %v4547_v30 }
0x188d   :  { %v4550_v27 = vadd.f32 %v2716_v24, %v4305_v4  ;;  %v2733_v62 = vmul.f32 %v4541_v11, %v4541_v11 }
0x188e   :  { %v2736_v2 = vmul.f32 %v4544_v58, %v4544_v58  ;;  %v2743_v15 = vsel %vm1737_vm12, %v2735_v52, 0.0 }
0x188f   :  { %v2737_v0 = vsel %vm1737_vm12, %v2733_v62, 0.0  ;;  %v2734_v50 = vmul.f32 %v4550_v27, %v4550_v27 }
0x1890   :  { %2738 = vadd.xlane.f32.xlu1 %v2737_v0  ;;  %v2746_v4 = vsel %vm1737_vm12, %v2736_v2, 0.0 }
0x1891   :  { %v2740_v55 = vsel %vm1737_vm12, %v2734_v50, 0.0 }
0x1892   :  { %2741 = vadd.xlane.f32.xlu0 %v2740_v55 }
0x1894   :  { %2747 = vadd.xlane.f32.xlu1 %v2746_v4 }
0x1896   :  { %2744 = vadd.xlane.f32.xlu0 %v2743_v15 }
0x191d   :  { %v2739_v6 = vpop.xlane.xlu1 %2738 }
0x191e   :  { %v2749_v9 = vmul.f32 0.03125, %v2739_v6 }
0x191f   :  { %v2742_v26 = vpop.xlane.xlu0 %2741 }
0x1920   :  { %v2753_v33 = vadd.f32 1e-06, %v2749_v9  ;;  %v2750_v3 = vmul.f32 0.03125, %v2742_v26 }
0x1921   :  { %v2748_v10 = vpop.xlane.xlu1 %2747 }
0x1922   :  { %3769 = vrsqrt.f32 %v2753_v33  ;;  %v2754_v16 = vadd.f32 1e-06, %v2750_v3  ;;  %v2752_v14 = vmul.f32 0.03125, %v2748_v10 }
0x1923   :  { %v2745_v21 = vpop.xlane.xlu0 %2744 }
0x1924   :  { %3771 = vrsqrt.f32 %v2754_v16  ;;  %v2756_v42 = vadd.f32 1e-06, %v2752_v14  ;;  %v2751_v7 = vmul.f32 0.03125, %v2745_v21 }
0x1926   :  { %3773 = vrsqrt.f32 %v2756_v42  ;;  %v2755_v29 = vadd.f32 1e-06, %v2751_v7 }
0x1928   :  { %3775 = vrsqrt.f32 %v2755_v29 }
0x192c   :  { %v3770_v12 = vpop.eup %3769 }
0x192d   :  { %v2761_v13 = vmul.f32 %v3770_v12, %v4541_v11 }
0x192e   :  { %v3772_v17 = vpop.eup %3771 }
0x192f   :  { %v2762_v1 = vmul.f32 %v3772_v17, %v4550_v27  ;;  %v2769_v40 = vmul.f32 %v3218_v19, %v2761_v13 }
0x1930   :  { %v3774_v39 = vpop.eup %3773 }
0x1931   :  { %v2764_v25 = vmul.f32 %v3774_v39, %v4544_v58  ;;  %v2770_v28 = vmul.f32 %v3218_v19, %v2762_v1 }
0x1932   :  { %v3776_v31 = vpop.eup %3775 }
0x1933   :  { %v2763_v32 = vmul.f32 %v3776_v31, %v4547_v30  ;;  %v2777_v36 = vpack.c.bf16 %v2770_v28, %v2769_v40  ;;  %v2772_v41 = vmul.f32 %v3218_v19, %v2764_v25 }
0x1935   :  { %3583 = vmatprep.mubr.msk.bf16.mxu1 %vm1737_vm12, %v2777_v36  ;;  %v2771_v18 = vmul.f32 %v3218_v19, %v2763_v32 }
0x1937   :  { %v2778_v37 = vpack.c.bf16 %v2772_v41, %v2771_v18 }
0x1939   :  { %3584 = vmatmul.mubr.msk.bf16.vlgmr.msra.gmra.mrb[72].mxu1 %vm1737_vm12, %v2778_v37 }
0x1a0c   :  { %v3585_v43 = vpop.f32.mrb[72].mxu1 }
0x1a0d   :  { %v2831_v45 = vpop.f32.mrb[73].mxu1  ;;  %v3225_v51 = vmul.f32 -1.442695, %v3585_v43 }
0x1a0e   :  { %2878 = vrot.lane.b32.xlu0 %v2831_v45, %s3839_s2  ;;  %v3586_v46 = vpop.f32.mrb[74].mxu1  ;;  %v3223_v48 = vmul.f32 -1.442695, %v2831_v45 }
0x1a0f   :  { %v2834_v47 = vpop.f32.mrb[75].mxu1  ;;  %v3226_v53 = vmul.f32 -1.442695, %v3586_v46 }
0x1a10   :  { %2880 = vrot.lane.b32.xlu1 %v2834_v47, %s3839_s2  ;;  %v3224_v49 = vmul.f32 -1.442695, %v2834_v47  ;;  %3777 = vpow2.f32 %v3223_v48 }
0x1a12   :  { %2884 = vrot.lane.b32.xlu0 %v3586_v46, %s3839_s2  ;;  %3779 = vpow2.f32 %v3224_v49 }
0x1a13   :  { %3781 = vpow2.f32 %v3225_v51 }
0x1a14   :  { %2882 = vrot.lane.b32.xlu1 %v3585_v43, %s3839_s2  ;;  %3783 = vpow2.f32 %v3226_v53  ;;  %s3110_s2 = sshll.u32 %s3843_s26, 4  ;;  %s3111_s2 = int_to_ptr.vmem [resolvable:$true] %s3110_s2 }
0x1a15   :  { %p3806_p1 = scmp.lt.s32.totalorder %s3111_s2, %s3111_s2 }
0x1a1a   :  { %v3778_v54 = vpop.eup %3777 }
0x1a1b   :  { %v2858_v57 = vadd.f32 1.0, %v3778_v54 }
0x1a1c   :  { %v3780_v56 = vpop.eup %3779 }
0x1a1d   :  { %v3782_v59 = vpop.eup %3781  ;;  %v2859_v20 = vadd.f32 1.0, %v3780_v56  ;;  %3785 = vrcp.f32 %v2858_v57 }
0x1a1e   :  { %v3784_v60 = vpop.eup %3783  ;;  %v2860_v61 = vadd.f32 1.0, %v3782_v59 }
0x1a1f   :  { %v2861_v63 = vadd.f32 1.0, %v3784_v60  ;;  %3787 = vrcp.f32 %v2859_v20 }
0x1a20   :  { %3789 = vrcp.f32 %v2860_v61 }
0x1a21   :  { %3791 = vrcp.f32 %v2861_v63 }
0x1a27   :  { %v3786_v23 = vpop.eup %3785 }
0x1a28   :  { %v2870_v0 = vmul.f32 %v3786_v23, %v2831_v45 }
0x1a29   :  { %v3788_v22 = vpop.eup %3787 }
0x1a2a   :  { %v3790_v62 = vpop.eup %3789  ;;  %v2871_v50 = vmul.f32 %v3788_v22, %v2834_v47  ;;  %v3233_v47 = vld [vmem:[%s4644_s16 + $0xd] ss:$0 sm:$0xff]  ;;  %s3801_s16 = scalar_lea.vmem %s3111_s2, 512 }
0x1a2b   :  { %v3792_v2 = vpop.eup %3791  ;;  %v2872_v6 = vmul.f32 %v3790_v62, %v3585_v43  ;;  %p3802_p0 = scmp.ne.s32.totalorder %s3111_s2, %s3801_s16  ;;  %p3807_p2 = scmp.lt.s32.totalorder %s3801_s16, %s3801_s16 }
0x1a2c   :  { %v2873_v8 = vmul.f32 %v3792_v2, %v3586_v46 }
0x1a2d   :  { %p3808_p3 = por %p3807_p2, %p3806_p1 }
0x1a2f   :  { %p3809_p4 = pnand %p3808_p3, %p3802_p0 }
0x1a80   :  { %v2879_v24 = vpop.permute.xlu0 %2878 }
0x1a81   :  { %v2890_v52 = vmul.f32 %v2879_v24, %v2870_v0 }
0x1a82   :  { %v2881_v55 = vpop.permute.xlu1 %2880 }
0x1a83   :  { %v2891_v4 = vmul.f32 %v2881_v55, %v2871_v50 }
0x1a84   :  { %v2885_v15 = vpop.permute.xlu0 %2884 }
0x1a85   :  { %v2902_v5 = vpack.c.bf16 %v2891_v4, %v2890_v52  ;;  %v2893_v26 = vmul.f32 %v2885_v15, %v2873_v8 }
0x1a86   :  { %v2883_v9 = vpop.permute.xlu1 %2882 }
0x1a87   :  { %v2892_v33 = vmul.f32 %v2883_v9, %v2872_v6  ;;  %3595 = vmatprep.mubr.msk.bf16.mxu0 %vm165_vm0, %v2902_v5 }
0x1a89   :  { %v2903_v3 = vpack.c.bf16 %v2893_v26, %v2892_v33 }
0x1a8b   :  { %3596 = vmatmul.mubr.msk.bf16.vlgmr.msra.gmra.mrb[68].mxu0 %vm165_vm0, %v2903_v3 }
0x1b5e   :  { %v3597_v10 = vpop.f32.mrb[68].mxu0 }
0x1b5f   :  { %v2968_v16 = vpop.f32.mrb[69].mxu0  ;;  %v2985_v29 = vadd.f32 %v3597_v10, %v4547_v30  ;;  %v3683_v30 = vld [vmem:[%s4642_s14] sm:$0xff]  }
0x1b60   :  { %v2983_v14 = vadd.f32 %v2968_v16, %v4541_v11  ;;  %v3598_v21 = vpop.f32.mrb[70].mxu0  ;;  %3599 = vmatprep.subr.bf16.mxu1 %v3683_v30 }
0x1b61   :  { %v2986_v42 = vadd.f32 %v3598_v21, %v4544_v58  ;;  %v2971_v7 = vpop.f32.mrb[71].mxu0  ;;  %v2990_v39 = vmul.f32 %v2985_v29, %v2985_v29  ;;  %3600 = vmatpush3.bf16.msra.mxu1 %v3683_v30 }
0x1b62   :  { %v2988_v12 = vmul.f32 %v2983_v14, %v2983_v14  ;;  %v2984_v13 = vadd.f32 %v2971_v7, %v4550_v27  ;;  %v3684_v27 = vld [vmem:[%s4642_s14 + $0x8] sm:$0xff]  }
0x1b63   :  { %v2991_v17 = vmul.f32 %v2986_v42, %v2986_v42  ;;  %v2998_v58 = vsel %vm1737_vm12, %v2990_v39, 0.0  ;;  %3601 = vmatprep.subr.bf16.mxu1 %v3684_v27 }
0x1b64   :  { %v2989_v19 = vmul.f32 %v2984_v13, %v2984_v13  ;;  %v2992_v1 = vsel %vm1737_vm12, %v2988_v12, 0.0 }
0x1b65   :  { %2993 = vadd.xlane.f32.xlu1 %v2992_v1  ;;  %v3001_v11 = vsel %vm1737_vm12, %v2991_v17, 0.0  ;;  %3602 = vmatpush3.bf16.msra.mxu1 %v3684_v27 }
0x1b66   :  { %v2995_v25 = vsel %vm1737_vm12, %v2989_v19, 0.0 }
0x1b67   :  { %2996 = vadd.xlane.f32.xlu0 %v2995_v25 }
0x1b69   :  { %3002 = vadd.xlane.f32.xlu1 %v3001_v11 }
0x1b6b   :  { %2999 = vadd.xlane.f32.xlu0 %v2998_v58 }
0x1bf2   :  { %v2994_v40 = vpop.xlane.xlu1 %2993 }
0x1bf3   :  { %v3004_v28 = vmul.f32 0.03125, %v2994_v40 }
0x1bf4   :  { %v2997_v31 = vpop.xlane.xlu0 %2996 }
0x1bf5   :  { %v3008_v32 = vadd.f32 1e-06, %v3004_v28  ;;  %v3005_v36 = vmul.f32 0.03125, %v2997_v31 }
0x1bf6   :  { %v3003_v18 = vpop.xlane.xlu1 %3002 }
0x1bf7   :  { %3793 = vrsqrt.f32 %v3008_v32  ;;  %v3009_v41 = vadd.f32 1e-06, %v3005_v36  ;;  %v3007_v37 = vmul.f32 0.03125, %v3003_v18 }
0x1bf8   :  { %v3000_v38 = vpop.xlane.xlu0 %2999 }
0x1bf9   :  { %3795 = vrsqrt.f32 %v3009_v41  ;;  %v3011_v34 = vadd.f32 1e-06, %v3007_v37  ;;  %v3006_v44 = vmul.f32 0.03125, %v3000_v38 }
0x1bfb   :  { %3797 = vrsqrt.f32 %v3011_v34  ;;  %v3010_v35 = vadd.f32 1e-06, %v3006_v44 }
0x1bfd   :  { %3799 = vrsqrt.f32 %v3010_v35 }
0x1c01   :  { %v3794_v43 = vpop.eup %3793 }
0x1c02   :  { %v3016_v45 = vmul.f32 %v3794_v43, %v2983_v14 }
0x1c03   :  { %v3796_v46 = vpop.eup %3795 }
0x1c04   :  { %v3017_v48 = vmul.f32 %v3796_v46, %v2984_v13  ;;  %v3024_v53 = vmul.f32 %v3233_v47, %v3016_v45 }
0x1c05   :  { %v3798_v49 = vpop.eup %3797 }
0x1c06   :  { %v3019_v51 = vmul.f32 %v3798_v49, %v2986_v42  ;;  %v3025_v54 = vmul.f32 %v3233_v47, %v3017_v48 }
0x1c07   :  { %v3800_v56 = vpop.eup %3799 }
0x1c08   :  { %v3018_v57 = vmul.f32 %v3800_v56, %v2985_v29  ;;  %v3032_v59 = vpack.c.bf16 %v3025_v54, %v3024_v53  ;;  %v3027_v60 = vmul.f32 %v3233_v47, %v3019_v51 }
0x1c0a   :  { %3603 = vmatprep.mubr.msk.bf16.mxu1 %vm1737_vm12, %v3032_v59  ;;  %v3026_v20 = vmul.f32 %v3233_v47, %v3018_v57 }
0x1c0c   :  { %v3033_v61 = vpack.c.bf16 %v3027_v60, %v3026_v20 }
0x1c0e   :  { %3604 = vmatmul.mubr.msk.bf16.vlgmr.msra.gmra.mrb[76].mxu1 %vm1737_vm12, %v3033_v61 }
0x1ce1   :  { %v3605_v63 = vpop.f32.mrb[76].mxu1 }
0x1ce2   :  { %3103 = vst [vmem:[#allocation3 + $0x10] sm:$0xff] %v3605_v63  ;;  %v3086_v23 = vpop.f32.mrb[77].mxu1 }
0x1ce3   :  { %3101 = vst [vmem:[#allocation3] sm:$0xff] %v3086_v23  ;;  %v3606_v22 = vpop.f32.mrb[78].mxu1 }
0x1ce4   :  { %3104 = vst [vmem:[#allocation3 + $0x18] sm:$0xff] %v3606_v22  ;;  %v3089_v24 = vpop.f32.mrb[79].mxu1 }
0x1ce5   :  { %3102 = vst [vmem:[#allocation3 + $0x8] sm:$0xff] %v3089_v24 }
0x1ce6   :  { %3812 = shalt.err (!%p3809_p4)
}
0x1ce7   :  { %s3813_s29 = scalar_lea.hbm %s4645_s17, 512 }
0x1ce8   :  { %p3814_p5 = scmp.ne.s32.totalorder %s4645_s17, %s3813_s29  ;;  %p3817_p6 = scmp.lt.u32.totalorder %s3813_s29, %s4645_s17 }
0x1cea   :  { %p3819_p7 = pnand %p3817_p6, %p3814_p5 }
0x1cec   :  { %3822 = shalt.err (!%p3819_p7)
}
0x1ced   :  { %s3844_s11 = smov 128   ;;  %s3845_s3 = smov 8  }
0x1cee   :  { %3116 = dma.vmem_to_hbm [thread:$0]  %s3111_s2, 512, %s4645_s17, [#allocation4], %s3844_s11, %s3844_s11, %s3845_s3  }
0x1cef   :  { %3823 = dma.done.wait [#allocation4], 512  }
0x1cf0   :  { %3824 = vsyncadd [#allocation4], 4294966784 }
0x1cf1   :  { %3120 = vsyncpa [#allocation4], 1 }

</bundles_post_ra>
